<compile_context>
chip_gen: v7x
topology: tpu7x:2x2x1
jax: 0.10.0
libtpu: 0.0.40
codegen_flags: <defaults>
</compile_context>

<pallas_src>
import functools

import jax
import jax.numpy as jnp
from jax.experimental import pallas as pl
from jax.experimental.pallas import tpu as pltpu

LANE = 128
_VMEM_LIMIT = 64 * 1024 * 1024  # explicit scoped-VMEM headroom (v5e/v6e default is 16/32 MiB)


def _round_up(x, m):
    return ((x + m - 1) // m) * m


def _pad_channels(x, cp):
    c = x.shape[-1]
    if c == cp:
        return x
    return jnp.pad(x, ((0, 0),) * (x.ndim - 1) + ((0, cp - c),))


# ----------------------------------------------------------------------------
# Generic matmul kernel: out = A @ B  (bf16 inputs, fp32 MXU accumulation)
# ----------------------------------------------------------------------------
def _matmul_kernel(a_ref, b_ref, o_ref):
    o_ref[...] = jnp.dot(
        a_ref[...], b_ref[...], preferred_element_type=jnp.float32
    ).astype(o_ref.dtype)


def matmul(a, b, *, out_dtype=jnp.float32, tm=256, tn=512):
    """A @ B with bf16 operands on the MXU and lane-dense (multiple-of-128) N tiles.

    K is kept whole (it is small by construction in this model); for large K a
    third 'arbitrary' grid axis with an fp32 VMEM accumulator would be added.
    """
    M, K = a.shape
    K2, N = b.shape
    assert K == K2, (K, K2)
    a = a.astype(jnp.bfloat16)                      # bf16 at the pallas_call boundary
    b = b.astype(jnp.bfloat16)
    tm = min(tm, _round_up(M, 8))
    tn = min(tn, _round_up(N, LANE))
    grid = (pl.cdiv(M, tm), pl.cdiv(N, tn))         # no explicit M padding copy
    return pl.pallas_call(
        _matmul_kernel,
        out_shape=jax.ShapeDtypeStruct((M, N), out_dtype),
        grid_spec=pltpu.PrefetchScalarGridSpec(
            num_scalar_prefetch=0,
            grid=grid,
            in_specs=[
                pl.BlockSpec((tm, K), lambda i, j: (i, 0)),
                pl.BlockSpec((K, tn), lambda i, j: (0, j)),
            ],
            out_specs=pl.BlockSpec((tm, tn), lambda i, j: (i, j)),
        ),
        compiler_params=pltpu.CompilerParams(
            dimension_semantics=("parallel", "parallel"),   # 2-D grid -> megacore on v7x
            vmem_limit_bytes=_VMEM_LIMIT,
        ),
    )(a, b)


# ----------------------------------------------------------------------------
# Fused direct convolution kernel (no HBM im2col)
# ----------------------------------------------------------------------------
def _conv_kernel(x_ref, w_ref, b_ref, o_ref, *, taps, relu):
    # x_ref: [1, PH, L, Cp]   f32 padded/phase-split input (whole image in VMEM)
    # w_ref: [T,  Cp, Coutp]  bf16 per-tap weight slabs (resident, small)
    # b_ref: [1, Coutp]       f32
    # o_ref: [1, M, Coutp]    M = Ho*Wq slab rows (Wq-wide; garbage cols dropped outside)
    m = o_ref.shape[1]
    acc = jnp.zeros((m, o_ref.shape[2]), jnp.float32)
    for t, (ph, start) in enumerate(taps):
        # Static contiguous slice of the flattened phase grid = this tap's patch
        # slab.  Kept fp32 in VMEM (arbitrary sublane offsets), cast to bf16 for
        # the MXU; weights are already bf16.  fp32 accumulation throughout.
        a = x_ref[0, ph, start:start + m, :].astype(jnp.bfloat16)
        acc = acc + jnp.dot(a, w_ref[t], preferred_element_type=jnp.float32)
    acc = acc + b_ref[...]
    if relu:
        acc = jnp.maximum(acc, 0.0)
    o_ref[0] = acc.astype(o_ref.dtype)


def conv2d(x, p, *, stride=1, pad=0, relu=False, out_dtype=jnp.bfloat16):
    """x: [N, H, W, Cp] (Cp = lane-padded channels) -> [N, Ho, Wo, Coutp] (lane-padded)."""
    N, H, W, Cp = x.shape
    assert Cp == p["cinp"], (Cp, p["cinp"])
    KH, KW, s = p["kh"], p["kw"], stride
    coutp = p["coutp"]
    Ho = (H + 2 * pad - KH) // s + 1
    Wo = (W + 2 * pad - KW) // s + 1
    Hp = _round_up(H + 2 * pad, s)
    Wp = _round_up(W + 2 * pad, s)
    Hq, Wq = Hp // s, Wp // s
    M = Ho * Wq                                           # output slab rows per image
    # flattened phase-grid length; taps may run over the end into zero rows,
    # those rows only feed the (discarded) Wq-Wo garbage columns.
    L = max(Hq * Wq, ((KH - 1) // s) * Wq + (KW - 1) // s + M)

    # Wrapper prep: zero-pad spatially, phase-split by stride, flatten rows.
    # ~1x the activation bytes (fused XLA pad/transpose) instead of a 9x im2col
    # materialisation in HBM.
    xp = jnp.pad(x.astype(jnp.float32),
                 ((0, 0), (pad, Hp - H - pad), (pad, Wp - W - pad), (0, 0)))
    xph = xp.reshape(N, Hq, s, Wq, s, Cp).transpose(0, 2, 4, 1, 3, 5)
    xph = xph.reshape(N, s * s, Hq * Wq, Cp)
    if L > Hq * Wq:
        xph = jnp.pad(xph, ((0, 0), (0, 0), (0, L - Hq * Wq), (0, 0)))

    # per-tap (phase index, flat row offset): patch for tap (kh,kw) is the
    # contiguous slab starting at (kh//s)*Wq + (kw//s) of phase (kh%s, kw%s).
    taps = tuple(((kh % s) * s + (kw % s), (kh // s) * Wq + (kw // s))
                 for kh in range(KH) for kw in range(KW))

    out = pl.pallas_call(
        functools.partial(_conv_kernel, taps=taps, relu=relu),
        out_shape=jax.ShapeDtypeStruct((N, M, coutp), out_dtype),
        grid_spec=pltpu.PrefetchScalarGridSpec(
            num_scalar_prefetch=0,
            grid=(N,),                                     # batch axis -> megacore on v7x
            in_specs=[
                pl.BlockSpec((1, s * s, L, Cp), lambda n: (n, 0, 0, 0)),
                # weights/bias are tiny and revisited every step (constant index map);
                # pipeline_mode=pl.Buffered(1) would halve their VMEM if needed.
                pl.BlockSpec((KH * KW, Cp, coutp), lambda n: (0, 0, 0)),
                pl.BlockSpec((1, coutp), lambda n: (0, 0)),
            ],
            out_specs=pl.BlockSpec((1, M, coutp), lambda n: (n, 0, 0)),
        ),
        compiler_params=pltpu.CompilerParams(
            dimension_semantics=("parallel",),
            vmem_limit_bytes=_VMEM_LIMIT,
        ),
    )(xph, p["w"], p["b"])

    # drop the Wq-Wo slab garbage columns; keep the lane-padded (zero) channels so
    # every downstream load/store stays 128-lane dense.
    return out.reshape(N, Ho, Wq, coutp)[:, :, :Wo, :]


# ----------------------------------------------------------------------------
# Bilinear interpolation (align_corners=False) as two lane-dense matmuls
# ----------------------------------------------------------------------------
def _bilinear_matrix(out_size, in_size):
    i = jnp.arange(out_size, dtype=jnp.float32)
    scale = in_size / out_size
    src = jnp.maximum((i + 0.5) * scale - 0.5, 0.0)       # PyTorch clamps negatives
    i0 = jnp.minimum(jnp.floor(src).astype(jnp.int32), in_size - 1)
    i1 = jnp.minimum(i0 + 1, in_size - 1)
    frac = src - i0.astype(jnp.float32)
    L = jnp.zeros((out_size, in_size), jnp.float32)
    L = L.at[jnp.arange(out_size), i0].add(1.0 - frac)
    L = L.at[jnp.arange(out_size), i1].add(frac)
    return L


def bilinear_resize(x, out_hw):
    """x: [N, H, W, C] (C lane-padded) -> [N, Ho, Wo, C]; no NHWC transposes, no zero bias."""
    N, H, W, C = x.shape
    Ho, Wo = out_hw
    Lh = _bilinear_matrix(Ho, H)                          # [Ho, H]
    Lw = _bilinear_matrix(Wo, W)                          # [Wo, W]
    # H-resize: fold the batch into a block-diagonal interpolation matrix so the
    # whole step is one matmul with W*C (multiple of 128) in the lane dim.
    a1 = jnp.kron(jnp.eye(N, dtype=jnp.float32), Lh)      # [N*Ho, N*H]
    y = matmul(a1, x.reshape(N * H, W * C), out_dtype=jnp.bfloat16)   # [N*Ho, W*C]
    # W-resize: move the contraction onto the lane dim with kron(Lw^T, I_C);
    # output lanes Wo*C are a large multiple of 128 (unmasked stores).
    b2 = jnp.kron(Lw.T, jnp.eye(C, dtype=jnp.float32))    # [W*C, Wo*C]
    z = matmul(y, b2, out_dtype=jnp.float32)              # [N*Ho, Wo*C]
    return z.reshape(N, Ho, Wo, C)


# ----------------------------------------------------------------------------
# ServerModel (small synthetic configuration, deterministic weights)
# ----------------------------------------------------------------------------
def _make_conv_params(key, kh, kw, cin, cout):
    k1, k2 = jax.random.split(key)
    scale = 1.0 / jnp.sqrt(jnp.float32(kh * kw * cin))
    w = jax.random.normal(k1, (kh, kw, cin, cout), jnp.float32) * scale
    b = jax.random.normal(k2, (cout,), jnp.float32) * 0.01
    # Lane-pad both channel dims to 128 (zero rows/cols are exact no-ops through
    # conv+bias+ReLU) and store weights pre-reshaped per tap, in bf16.
    cinp, coutp = _round_up(cin, LANE), _round_up(cout, LANE)
    wp = jnp.zeros((kh * kw, cinp, coutp), jnp.float32)
    wp = wp.at[:, :cin, :cout].set(w.reshape(kh * kw, cin, cout))
    bp = jnp.zeros((1, coutp), jnp.float32).at[0, :cout].set(b)
    return dict(w=wp.astype(jnp.bfloat16), b=bp, kh=kh, kw=kw,
                cin=cin, cout=cout, cinp=cinp, coutp=coutp)


class ServerModelPallas:
    """JAX/Pallas analogue of ServerModel: decoder -> backbone -> heads -> upsample."""

    def __init__(self, key, latent_ch=8, num_classes=21):
        ks = jax.random.split(key, 9)
        self.num_classes = num_classes
        # bottleneck decoder (restores backbone features from decoded latent)
        self.dec1 = _make_conv_params(ks[0], 3, 3, latent_ch, 16)
        self.dec2 = _make_conv_params(ks[1], 3, 3, 16, 16)
        # backbone continuation (layer2 / layer3 -> 'aux' / layer4 -> 'out')
        self.layer2 = _make_conv_params(ks[2], 3, 3, 16, 24)
        self.layer3 = _make_conv_params(ks[3], 3, 3, 24, 32)   # 'aux' features
        self.layer4 = _make_conv_params(ks[4], 3, 3, 32, 48)   # 'out' features
        # classifier (DeepLabHead, simplified: 3x3 conv+ReLU, 1x1 -> classes)
        self.cls1 = _make_conv_params(ks[5], 3, 3, 48, 32)
        self.cls2 = _make_conv_params(ks[6], 1, 1, 32, num_classes)
        # aux classifier (FCNHead: 3x3 conv+ReLU, 1x1 -> classes)
        self.aux1 = _make_conv_params(ks[7], 3, 3, 32, 16)
        self.aux2 = _make_conv_params(ks[8], 1, 1, 16, num_classes)

    # --- decode(strings, shape) -------------------------------------------
    def decode(self, latent_hat):
        # TODO(synk): entropy_bottleneck.decompress (range/arithmetic decoding of
        # byte strings) has no Pallas equivalent; we accept the dequantized
        # latent tensor directly and apply the bottleneck decoder convs.
        latent_hat = jnp.round(latent_hat)                 # mimic quantized latent
        x = _pad_channels(latent_hat, self.dec1["cinp"])
        x = conv2d(x, self.dec1, stride=1, pad=1, relu=True)
        x = conv2d(x, self.dec2, stride=1, pad=1, relu=True)
        return x

    # --- backbone_forward ----------------------------------------------------
    def backbone_forward(self, x):
        out = {}
        x = conv2d(x, self.layer2, stride=2, pad=1, relu=True)
        x = conv2d(x, self.layer3, stride=1, pad=1, relu=True)
        out["aux"] = x
        x = conv2d(x, self.layer4, stride=1, pad=1, relu=True)
        out["out"] = x
        return out

    def classifier(self, x):
        x = conv2d(x, self.cls1, stride=1, pad=1, relu=True)
        return conv2d(x, self.cls2, stride=1, pad=0, relu=False)

    def aux_classifier(self, x):
        x = conv2d(x, self.aux1, stride=1, pad=1, relu=True)
        return conv2d(x, self.aux2, stride=1, pad=0, relu=False)

    # --- forward -------------------------------------------------------------
    def forward(self, latent_nchw, input_shape):
        latent = jnp.transpose(latent_nchw, (0, 2, 3, 1))  # NCHW -> NHWC (boundary)
        features = self.backbone_forward(self.decode(latent))
        result = {}
        for name, head in (("out", self.classifier), ("aux", self.aux_classifier)):
            x = head(features[name])                       # [N, h, w, 128] lane-padded
            x = bilinear_resize(x, input_shape)            # [N, Ho, Wo, 128]
            x = x[..., : self.num_classes]                 # drop channel padding at the end
            result[name] = jnp.transpose(x, (0, 3, 1, 2))  # back to NCHW
        return result


if __name__ == "__main__":
    key = jax.random.PRNGKey(0)
    k_model, k_latent = jax.random.split(key)

    model = ServerModelPallas(k_model, latent_ch=8, num_classes=21)

    # decoded latent ("features"): batch=2, latent channels=8, spatial 8x8 (NCHW)
    latent = jax.random.normal(k_latent, (2, 8, 8, 8), jnp.float32) * 2.0
    input_shape = (16, 16)

    result = model.forward(latent, input_shape)
    jax.block_until_ready(result)

    assert result["out"].shape == (2, 21, 16, 16), result["out"].shape
    assert result["aux"].shape == (2, 21, 16, 16), result["aux"].shape
    assert bool(jnp.all(jnp.isfinite(result["out"])))
    assert bool(jnp.all(jnp.isfinite(result["aux"])))
    print("KERNEL_OK")
</pallas_src>

<mosaic_0001>
module attributes {stable_mosaic.version = 11 : i64} {
  func.func @_conv_kernel(%arg0: i32, %arg1: memref<1x1x102x128xf32, #tpu.memory_space<vmem>>, %arg2: memref<9x128x128xbf16, #tpu.memory_space<vmem>>, %arg3: memref<1x128xf32, #tpu.memory_space<vmem>>, %arg4: memref<1x80x128xbf16, #tpu.memory_space<vmem>>) attributes {dimension_semantics = [#tpu.dimension_semantics<parallel>], iteration_bounds = array<i64: 2>, scalar_prefetch = 0 : i64, scratch_operands = 0 : i64, tpu.core_type = #tpu.core_type<tc>, window_params = [{transform_indices = @transform_0, window_bounds = array<i64: 1, 1, 102, 128>}, {pipeline_mode = #tpu.pipeline_mode<synchronous>, transform_indices = @transform_1, window_bounds = array<i64: 9, 128, 128>}, {pipeline_mode = #tpu.pipeline_mode<synchronous>, transform_indices = @transform_2, window_bounds = array<i64: 1, 128>}, {transform_indices = @transform_3, window_bounds = array<i64: 1, 80, 128>}]} {
    %cst = arith.constant 0.000000e+00 : f32
    %0 = vector.broadcast %cst : f32 to vector<80x128xf32>
    %c0 = arith.constant 0 : index
    %c0_0 = arith.constant 0 : index
    %c0_1 = arith.constant 0 : index
    %c0_2 = arith.constant 0 : index
    %1 = vector.load %arg1[%c0, %c0_0, %c0_1, %c0_2] : memref<1x1x102x128xf32, #tpu.memory_space<vmem>>, vector<1x1x80x128xf32>
    %2 = vector.shape_cast %1 : vector<1x1x80x128xf32> to vector<80x128xf32>
    %3 = arith.truncf %2 : vector<80x128xf32> to vector<80x128xbf16>
    %c0_3 = arith.constant 0 : index
    %c0_4 = arith.constant 0 : index
    %c0_5 = arith.constant 0 : index
    %4 = vector.load %arg2[%c0_3, %c0_4, %c0_5] : memref<9x128x128xbf16, #tpu.memory_space<vmem>>, vector<1x128x128xbf16>
    %5 = vector.shape_cast %4 : vector<1x128x128xbf16> to vector<128x128xbf16>
    %cst_6 = arith.constant dense<0.000000e+00> : vector<80x128xf32>
    %6 = tpu.matmul %3, %5, %cst_6 {dimension_numbers = #tpu.dot_dimension_numbers<[1], [0], [0], [1], [0, 0, 1, 1], [], []>} : vector<80x128xbf16>, vector<128x128xbf16>, vector<80x128xf32> -> vector<80x128xf32>
    %7 = arith.addf %0, %6 : vector<80x128xf32>
    %c0_7 = arith.constant 0 : index
    %c0_8 = arith.constant 0 : index
    %c1 = arith.constant 1 : index
    %c0_9 = arith.constant 0 : index
    %8 = vector.load %arg1[%c0_7, %c0_8, %c1, %c0_9] : memref<1x1x102x128xf32, #tpu.memory_space<vmem>>, vector<1x1x80x128xf32>
    %9 = vector.shape_cast %8 : vector<1x1x80x128xf32> to vector<80x128xf32>
    %10 = arith.truncf %9 : vector<80x128xf32> to vector<80x128xbf16>
    %c1_10 = arith.constant 1 : index
    %c0_11 = arith.constant 0 : index
    %c0_12 = arith.constant 0 : index
    %11 = vector.load %arg2[%c1_10, %c0_11, %c0_12] : memref<9x128x128xbf16, #tpu.memory_space<vmem>>, vector<1x128x128xbf16>
    %12 = vector.shape_cast %11 : vector<1x128x128xbf16> to vector<128x128xbf16>
    %cst_13 = arith.constant dense<0.000000e+00> : vector<80x128xf32>
    %13 = tpu.matmul %10, %12, %cst_13 {dimension_numbers = #tpu.dot_dimension_numbers<[1], [0], [0], [1], [0, 0, 1, 1], [], []>} : vector<80x128xbf16>, vector<128x128xbf16>, vector<80x128xf32> -> vector<80x128xf32>
    %14 = arith.addf %7, %13 : vector<80x128xf32>
    %c0_14 = arith.constant 0 : index
    %c0_15 = arith.constant 0 : index
    %c2 = arith.constant 2 : index
    %c0_16 = arith.constant 0 : index
    %15 = vector.load %arg1[%c0_14, %c0_15, %c2, %c0_16] : memref<1x1x102x128xf32, #tpu.memory_space<vmem>>, vector<1x1x80x128xf32>
    %16 = vector.shape_cast %15 : vector<1x1x80x128xf32> to vector<80x128xf32>
    %17 = arith.truncf %16 : vector<80x128xf32> to vector<80x128xbf16>
    %c2_17 = arith.constant 2 : index
    %c0_18 = arith.constant 0 : index
    %c0_19 = arith.constant 0 : index
    %18 = vector.load %arg2[%c2_17, %c0_18, %c0_19] : memref<9x128x128xbf16, #tpu.memory_space<vmem>>, vector<1x128x128xbf16>
    %19 = vector.shape_cast %18 : vector<1x128x128xbf16> to vector<128x128xbf16>
    %cst_20 = arith.constant dense<0.000000e+00> : vector<80x128xf32>
    %20 = tpu.matmul %17, %19, %cst_20 {dimension_numbers = #tpu.dot_dimension_numbers<[1], [0], [0], [1], [0, 0, 1, 1], [], []>} : vector<80x128xbf16>, vector<128x128xbf16>, vector<80x128xf32> -> vector<80x128xf32>
    %21 = arith.addf %14, %20 : vector<80x128xf32>
    %c0_21 = arith.constant 0 : index
    %c0_22 = arith.constant 0 : index
    %c10 = arith.constant 10 : index
    %c0_23 = arith.constant 0 : index
    %22 = vector.load %arg1[%c0_21, %c0_22, %c10, %c0_23] : memref<1x1x102x128xf32, #tpu.memory_space<vmem>>, vector<1x1x80x128xf32>
    %23 = vector.shape_cast %22 : vector<1x1x80x128xf32> to vector<80x128xf32>
    %24 = arith.truncf %23 : vector<80x128xf32> to vector<80x128xbf16>
    %c3 = arith.constant 3 : index
    %c0_24 = arith.constant 0 : index
    %c0_25 = arith.constant 0 : index
    %25 = vector.load %arg2[%c3, %c0_24, %c0_25] : memref<9x128x128xbf16, #tpu.memory_space<vmem>>, vector<1x128x128xbf16>
    %26 = vector.shape_cast %25 : vector<1x128x128xbf16> to vector<128x128xbf16>
    %cst_26 = arith.constant dense<0.000000e+00> : vector<80x128xf32>
    %27 = tpu.matmul %24, %26, %cst_26 {dimension_numbers = #tpu.dot_dimension_numbers<[1], [0], [0], [1], [0, 0, 1, 1], [], []>} : vector<80x128xbf16>, vector<128x128xbf16>, vector<80x128xf32> -> vector<80x128xf32>
    %28 = arith.addf %21, %27 : vector<80x128xf32>
    %c0_27 = arith.constant 0 : index
    %c0_28 = arith.constant 0 : index
    %c11 = arith.constant 11 : index
    %c0_29 = arith.constant 0 : index
    %29 = vector.load %arg1[%c0_27, %c0_28, %c11, %c0_29] : memref<1x1x102x128xf32, #tpu.memory_space<vmem>>, vector<1x1x80x128xf32>
    %30 = vector.shape_cast %29 : vector<1x1x80x128xf32> to vector<80x128xf32>
    %31 = arith.truncf %30 : vector<80x128xf32> to vector<80x128xbf16>
    %c4 = arith.constant 4 : index
    %c0_30 = arith.constant 0 : index
    %c0_31 = arith.constant 0 : index
    %32 = vector.load %arg2[%c4, %c0_30, %c0_31] : memref<9x128x128xbf16, #tpu.memory_space<vmem>>, vector<1x128x128xbf16>
    %33 = vector.shape_cast %32 : vector<1x128x128xbf16> to vector<128x128xbf16>
    %cst_32 = arith.constant dense<0.000000e+00> : vector<80x128xf32>
    %34 = tpu.matmul %31, %33, %cst_32 {dimension_numbers = #tpu.dot_dimension_numbers<[1], [0], [0], [1], [0, 0, 1, 1], [], []>} : vector<80x128xbf16>, vector<128x128xbf16>, vector<80x128xf32> -> vector<80x128xf32>
    %35 = arith.addf %28, %34 : vector<80x128xf32>
    %c0_33 = arith.constant 0 : index
    %c0_34 = arith.constant 0 : index
    %c12 = arith.constant 12 : index
    %c0_35 = arith.constant 0 : index
    %36 = vector.load %arg1[%c0_33, %c0_34, %c12, %c0_35] : memref<1x1x102x128xf32, #tpu.memory_space<vmem>>, vector<1x1x80x128xf32>
    %37 = vector.shape_cast %36 : vector<1x1x80x128xf32> to vector<80x128xf32>
    %38 = arith.truncf %37 : vector<80x128xf32> to vector<80x128xbf16>
    %c5 = arith.constant 5 : index
    %c0_36 = arith.constant 0 : index
    %c0_37 = arith.constant 0 : index
    %39 = vector.load %arg2[%c5, %c0_36, %c0_37] : memref<9x128x128xbf16, #tpu.memory_space<vmem>>, vector<1x128x128xbf16>
    %40 = vector.shape_cast %39 : vector<1x128x128xbf16> to vector<128x128xbf16>
    %cst_38 = arith.constant dense<0.000000e+00> : vector<80x128xf32>
    %41 = tpu.matmul %38, %40, %cst_38 {dimension_numbers = #tpu.dot_dimension_numbers<[1], [0], [0], [1], [0, 0, 1, 1], [], []>} : vector<80x128xbf16>, vector<128x128xbf16>, vector<80x128xf32> -> vector<80x128xf32>
    %42 = arith.addf %35, %41 : vector<80x128xf32>
    %c0_39 = arith.constant 0 : index
    %c0_40 = arith.constant 0 : index
    %c20 = arith.constant 20 : index
    %c0_41 = arith.constant 0 : index
    %43 = vector.load %arg1[%c0_39, %c0_40, %c20, %c0_41] : memref<1x1x102x128xf32, #tpu.memory_space<vmem>>, vector<1x1x80x128xf32>
    %44 = vector.shape_cast %43 : vector<1x1x80x128xf32> to vector<80x128xf32>
    %45 = arith.truncf %44 : vector<80x128xf32> to vector<80x128xbf16>
    %c6 = arith.constant 6 : index
    %c0_42 = arith.constant 0 : index
    %c0_43 = arith.constant 0 : index
    %46 = vector.load %arg2[%c6, %c0_42, %c0_43] : memref<9x128x128xbf16, #tpu.memory_space<vmem>>, vector<1x128x128xbf16>
    %47 = vector.shape_cast %46 : vector<1x128x128xbf16> to vector<128x128xbf16>
    %cst_44 = arith.constant dense<0.000000e+00> : vector<80x128xf32>
    %48 = tpu.matmul %45, %47, %cst_44 {dimension_numbers = #tpu.dot_dimension_numbers<[1], [0], [0], [1], [0, 0, 1, 1], [], []>} : vector<80x128xbf16>, vector<128x128xbf16>, vector<80x128xf32> -> vector<80x128xf32>
    %49 = arith.addf %42, %48 : vector<80x128xf32>
    %c0_45 = arith.constant 0 : index
    %c0_46 = arith.constant 0 : index
    %c21 = arith.constant 21 : index
    %c0_47 = arith.constant 0 : index
    %50 = vector.load %arg1[%c0_45, %c0_46, %c21, %c0_47] : memref<1x1x102x128xf32, #tpu.memory_space<vmem>>, vector<1x1x80x128xf32>
    %51 = vector.shape_cast %50 : vector<1x1x80x128xf32> to vector<80x128xf32>
    %52 = arith.truncf %51 : vector<80x128xf32> to vector<80x128xbf16>
    %c7 = arith.constant 7 : index
    %c0_48 = arith.constant 0 : index
    %c0_49 = arith.constant 0 : index
    %53 = vector.load %arg2[%c7, %c0_48, %c0_49] : memref<9x128x128xbf16, #tpu.memory_space<vmem>>, vector<1x128x128xbf16>
    %54 = vector.shape_cast %53 : vector<1x128x128xbf16> to vector<128x128xbf16>
    %cst_50 = arith.constant dense<0.000000e+00> : vector<80x128xf32>
    %55 = tpu.matmul %52, %54, %cst_50 {dimension_numbers = #tpu.dot_dimension_numbers<[1], [0], [0], [1], [0, 0, 1, 1], [], []>} : vector<80x128xbf16>, vector<128x128xbf16>, vector<80x128xf32> -> vector<80x128xf32>
    %56 = arith.addf %49, %55 : vector<80x128xf32>
    %c0_51 = arith.constant 0 : index
    %c0_52 = arith.constant 0 : index
    %c22 = arith.constant 22 : index
    %c0_53 = arith.constant 0 : index
    %57 = vector.load %arg1[%c0_51, %c0_52, %c22, %c0_53] : memref<1x1x102x128xf32, #tpu.memory_space<vmem>>, vector<1x1x80x128xf32>
    %58 = vector.shape_cast %57 : vector<1x1x80x128xf32> to vector<80x128xf32>
    %59 = arith.truncf %58 : vector<80x128xf32> to vector<80x128xbf16>
    %c8 = arith.constant 8 : index
    %c0_54 = arith.constant 0 : index
    %c0_55 = arith.constant 0 : index
    %60 = vector.load %arg2[%c8, %c0_54, %c0_55] : memref<9x128x128xbf16, #tpu.memory_space<vmem>>, vector<1x128x128xbf16>
    %61 = vector.shape_cast %60 : vector<1x128x128xbf16> to vector<128x128xbf16>
    %cst_56 = arith.constant dense<0.000000e+00> : vector<80x128xf32>
    %62 = tpu.matmul %59, %61, %cst_56 {dimension_numbers = #tpu.dot_dimension_numbers<[1], [0], [0], [1], [0, 0, 1, 1], [], []>} : vector<80x128xbf16>, vector<128x128xbf16>, vector<80x128xf32> -> vector<80x128xf32>
    %63 = arith.addf %56, %62 : vector<80x128xf32>
    %c0_57 = arith.constant 0 : index
    %c0_58 = arith.constant 0 : index
    %64 = vector.load %arg3[%c0_57, %c0_58] : memref<1x128xf32, #tpu.memory_space<vmem>>, vector<1x128xf32>
    %65 = vector.broadcast %64 : vector<1x128xf32> to vector<80x128xf32>
    %66 = arith.addf %63, %65 : vector<80x128xf32>
    %cst_59 = arith.constant 0.000000e+00 : f32
    %67 = vector.broadcast %cst_59 : f32 to vector<80x128xf32>
    %68 = arith.maximumf %66, %67 : vector<80x128xf32>
    %69 = arith.truncf %68 : vector<80x128xf32> to vector<80x128xbf16>
    %c0_60 = arith.constant 0 : index
    %c0_61 = arith.constant 0 : index
    %c0_62 = arith.constant 0 : index
    %70 = vector.load %arg4[%c0_60, %c0_61, %c0_62] : memref<1x80x128xbf16, #tpu.memory_space<vmem>>, vector<1x80x128xbf16>
    %71 = vector.shape_cast %70 : vector<1x80x128xbf16> to vector<80x128xbf16>
    %72 = vector.shape_cast %69 : vector<80x128xbf16> to vector<1x80x128xbf16>
    tpu.vector_store %arg4[%c0_60, %c0_61, %c0_62], %72 {strides = array<i32>} : memref<1x80x128xbf16, #tpu.memory_space<vmem>>, vector<1x80x128xbf16>,
    return
  }
  func.func @transform_0(%arg0: i32) -> (i32, i32, i32, i32) {
    %c0_i32 = arith.constant 0 : i32
    %c0_i32_0 = arith.constant 0 : i32
    %c0_i32_1 = arith.constant 0 : i32
    %c0_i32_2 = arith.constant 0 : i32
    return %arg0, %c0_i32, %c0_i32_0, %c0_i32_1 : i32, i32, i32, i32
  }
  func.func @transform_1(%arg0: i32) -> (i32, i32, i32) {
    %c0_i32 = arith.constant 0 : i32
    %c0_i32_0 = arith.constant 0 : i32
    %c0_i32_1 = arith.constant 0 : i32
    %c0_i32_2 = arith.constant 0 : i32
    return %c0_i32, %c0_i32_0, %c0_i32_1 : i32, i32, i32
  }
  func.func @transform_2(%arg0: i32) -> (i32, i32) {
    %c0_i32 = arith.constant 0 : i32
    %c0_i32_0 = arith.constant 0 : i32
    %c0_i32_1 = arith.constant 0 : i32
    return %c0_i32, %c0_i32_0 : i32, i32
  }
  func.func @transform_3(%arg0: i32) -> (i32, i32, i32) {
    %c0_i32 = arith.constant 0 : i32
    %c0_i32_0 = arith.constant 0 : i32
    %c0_i32_1 = arith.constant 0 : i32
    return %arg0, %c0_i32, %c0_i32_0 : i32, i32, i32
  }
}

</mosaic_0001>

<bundles_post_ra>
// kernel: tpu_custom_call.1
= control target key start
LH: loop header
LB: loop body
LE: loop exit
PB: predicated region body
PF: predicated region fallthrough
CT: control target
= control target key end

     0   :  { %8 = vsyncpa [#allocation3], 0  ;;  %s3315_s0 = inlined_call_operand.hbm [shape: f32[2,1,102,128], index: 0, kind: input, shape index: {}]   ;;  %s3316_s1 = inlined_call_operand.hbm [shape: bf16[9,128,128], index: 1, kind: input, shape index: {}]   ;;  %s3317_s2 = inlined_call_operand.hbm [shape: f32[1,128], index: 2, kind: input, shape index: {}]   ;;  %s3318_s3 = inlined_call_operand.hbm [shape: bf16[2,80,128], index: 3, kind: output, shape index: {}]  }
   0x1   :  { %10 = vsyncpa [#allocation3 + $0x1], 0 }
   0x2   :  { %11 = vsyncpa [#allocation6], 0 }
   0x3   :  { %12 = vsyncpa [#allocation4], 0 }
   0x4   :  { %14 = vsyncpa [#allocation4 + $0x1], 0  ;;  %s2779_s12 = smov 0   ;;  %s2781_s13 = smov 0  }
   0x5   :  { %s2783_s14 = smov 0   ;;  %s2785_s15 = smov 0  }
   0x6 LB: > { %s2800_s16 = sadd.s32 4294967295, %s2745_s15   ;;  %s1846_s17 = sadd.s32 4294967294, %s2745_s15   ;;  %s2745_s15 = sphi %s2785_s15, %s3338_s15   ;;  %s2741_s14 = sphi %s2783_s14, %s3337_s14   ;;  %s2737_s13 = sphi %s2781_s13, %s3336_s13   ;;  %s2733_s12 = sphi %s2779_s12, %s3335_s12  }
   0x7   : > { %p40_p0 = scmp.ne.s32.totalorder %s2737_s13, %s2733_s12  ;;  %p3319_p1 = scmp.eq.s32.totalorder %s2800_s16, 0 }
   0x8   : > { %p112_p3 = scmp.eq.s32.totalorder %s1846_s17, 1  ;;  %p1847_p5 = scmp.ge.s32.totalorder %s2745_s15, 1 }
   0x9   : > { %p2809_p4 = por %p3319_p1, %p40_p0  ;;  %p119_p7 = scmp.lt.s32.totalorder %s2745_s15, 3 }
   0xa   : > { %p2814_p6 = por %p112_p3, %p40_p0  ;;  %s2747_s21 = smov [#allocation5]  }
   0xb   : > { %s3322_s18 = scalar_select %p2809_p4, 1, 0 }
   0xc   : > { %s3323_s19 = scalar_select %p2814_p6, 1, 0 }
   0xd   : > { %p2819_p8 = pnand %p1847_p5, %p119_p7  ;;  %s131_s22 = sshll.u32 %s2747_s21, 4  ;;  %s2823_s22 = int_to_ptr.vmem [resolvable:$true] %s131_s22 }
   0xe   : > { %s2748_s24 = smov [#allocation7]   ;;  %s2589_s28 = scalar_lea.hbm %s3316_s1, 9216 }
   0xf   : > { %p2454_p9 = pneg %p2819_p8  ;;  %s145_s25 = sshll.u32 %s2748_s24, 4  ;;  %s2834_s25 = int_to_ptr.vmem [resolvable:$true] %s145_s25 }
  0x10   : > { %p2590_p12 = scmp.ne.s32.totalorder %s3316_s1, %s2589_s28  ;;  %p2596_p5 = scmp.lt.u32.totalorder %s2589_s28, %s3316_s1 }
  0x11   : > { %p2830_p11 = pnand %p2454_p9, %p3319_p1 }
  0x13   : > { %p2591_p13 = pneg %p2830_p11 }
  0x15   : > { %p2592_p0 = pnand %p2591_p13, %p2590_p12 }
  0x17   : > { %p2593_p3 = pneg %p2592_p0 }
  0x19   : > { %p2598_p7 = pnand %p2596_p5, %p2593_p3 }
  0x1b   : > { %2601 = shalt.err (!%p2598_p7)
}
  0x1c   : > { %s2602_s6 = scalar_lea.vmem %s2823_s22, 9216  ;;  %p2610_p2 = scmp.lt.s32.totalorder %s2823_s22, %s2823_s22 }
  0x1d   : > { %p2603_p9 = scmp.ne.s32.totalorder %s2823_s22, %s2602_s6  ;;  %p2611_p12 = scmp.lt.s32.totalorder %s2602_s6, %s2602_s6 }
  0x1f   : > { %p2605_p10 = pnand %p2603_p9, %p2591_p13  ;;  %p2612_p0 = por %p2611_p12, %p2610_p2 }
  0x21   : > { %p2606_p1 = pneg %p2605_p10 }
  0x23   : > { %p2613_p6 = pnand %p2612_p0, %p2606_p1 }
  0x25   : > { %2616 = shalt.err (!%p2613_p6)
}
  0x26   : > { %s2749_s7 = smov 64   ;;  %s2750_s8 = smov 4  }
  0x27   : > { %2457 = dma.hbm_to_vmem [thread:$0]  (!%p2830_p11), %s3316_s1, 9216, %s2823_s22, [#allocation6], %s2749_s7, %s2749_s7, %s2750_s8  }
  0x28   : > { %s2617_s21 = scalar_lea.hbm %s3317_s2, 16 }
  0x29   : > { %p2618_p2 = scmp.ne.s32.totalorder %s3317_s2, %s2617_s21  ;;  %p2624_p10 = scmp.lt.u32.totalorder %s2617_s21, %s3317_s2 }
  0x2b   : > { %p2620_p1 = pnand %p2618_p2, %p2591_p13 }
  0x2d   : > { %p2621_p6 = pneg %p2620_p1 }
  0x2f   : > { %p2626_p3 = pnand %p2624_p10, %p2621_p6 }
  0x31   : > { %2629 = shalt.err (!%p2626_p3)
}
  0x32   : > { %s2630_s22 = scalar_lea.vmem %s2834_s25, 16  ;;  %s2637_s29 = scalar_lea.vmem %s2834_s25, 32 }
  0x33   : > { %p2631_p5 = scmp.ne.s32.totalorder %s2834_s25, %s2630_s22  ;;  %p2638_p12 = scmp.lt.s32.totalorder %s2834_s25, %s2834_s25 }
  0x34   : > { %p2639_p0 = scmp.lt.s32.totalorder %s2637_s29, %s2630_s22 }
  0x35   : > { %p2633_p7 = pnand %p2631_p5, %p2591_p13 }
  0x36   : > { %p2640_p2 = por %p2639_p0, %p2638_p12 }
  0x37   : > { %p2634_p9 = pneg %p2633_p7 }
  0x39   : > { %p2641_p1 = pnand %p2640_p2, %p2634_p9 }
  0x3b   : > { %2644 = shalt.err (!%p2641_p1)
}
  0x3c   : > { %2460 = dma.hbm_to_vmem [thread:$0]  (!%p2830_p11), %s3317_s2, 16, %s2834_s25, [#allocation6]  }
  0x3d   : > { %s2890_s5 = sadd.s32 1, %s2745_s15   ;;  %s27_s23 = sadd.s32 1, %s2741_s14 }
  0x3e   : > { %s24_s6 = ssub.s32 %s2745_s15, %s2890_s5  ;;  %p34_p13 = scmp.ne.s32.totalorder %s2741_s14, %s2737_s13 }
  0x3f   : > { %p25_p6 = scmp.eq.s32.totalorder %s24_s6, 0  ;;  %p35_p10 = scmp.eq.s32.totalorder %s2745_s15, 0 }
  0x40   : > { %p3326_p3 = scmp.eq.s32.totalorder %s2800_s16, 1  ;;  %p2471_p7 = scmp.lt.s32.totalorder %s2745_s15, 2 }
  0x41   : > { %s2906_s8 = scalar_select %p25_p6, %s2741_s14, %s27_s23  }
  0x42   : > { %p2900_p5 = por %p3326_p3, %p34_p13  ;;  %p36_p9 = por %p35_p10, %p34_p13 }
  0x43   : > { %s156_s9 = sand.u32 1, %s2741_s14   ;;  %s2438_s25 = smul.u32 1664, %s2745_s15 }
  0x44   : > { %s3327_s7 = scalar_select %p2900_p5, 1, 0 }
  0x45   : > { %s2437_s10 = smul.u32 104, %s156_s9  ;;  %p2910_p11 = pnand %p2471_p7, %p36_p9 }
  0x46   : > { %s2917_s24 = scalar_lea.hbm %s3315_s0, %s2438_s25  ;;  %s2921_s28 = scalar_lea.sflag [#allocation3], %s156_s9 }
  0x47   : > { %s160_s26 = scalar_lea.vmem [#allocation2], %s2437_s10  ;;  %s2645_s22 = scalar_lea.hbm %s2917_s24, 1664 }
  0x48   : > { %s167_s27 = sshll.u32 %s160_s26, 4  ;;  %p2646_p12 = scmp.ne.s32.totalorder %s2917_s24, %s2645_s22  ;;  %s2919_s27 = int_to_ptr.vmem [resolvable:$true] %s167_s27 }
  0x49   : > { %p2647_p0 = pneg %p2910_p11  ;;  %s2650_s4 = scalar_lea.hbm %s3315_s0, 3328 }
  0x4a   : > { %p2651_p13 = scmp.lt.u32.totalorder %s2917_s24, %s3315_s0  ;;  %p2652_p6 = scmp.lt.u32.totalorder %s2650_s4, %s2645_s22 }
  0x4b   : > { %p2648_p2 = pnand %p2647_p0, %p2646_p12  ;;  %p2654_p3 = scmp.lt.u32.totalorder %s2645_s22, %s2917_s24 }
  0x4c   : > { %p2653_p10 = por %p2652_p6, %p2651_p13 }
  0x4d   : > { %p2649_p1 = pneg %p2648_p2 }
  0x4e   : > { %p2655_p7 = por %p2654_p3, %p2653_p10 }
  0x50   : > { %p2656_p9 = pnand %p2655_p7, %p2649_p1 }
  0x52   : > { %2659 = shalt.err (!%p2656_p9)
}
  0x53   : > { %s2660_s9 = scalar_lea.vmem %s2919_s27, 1664  ;;  %s2751_s10 = smov [#allocation2]  }
  0x54   : > { %p2661_p12 = scmp.ne.s32.totalorder %s2919_s27, %s2660_s9  ;;  %s2665_s25 = sshll.u32 %s2751_s10, 4  ;;  %s2666_s25 = int_to_ptr.vmem [resolvable:$false] %s2665_s25 }
  0x55   : > { %s2667_s17 = scalar_lea.vmem %s2666_s25, 3328  ;;  %p2668_p4 = scmp.lt.s32.totalorder %s2919_s27, %s2666_s25 }
  0x56   : > { %p2663_p2 = pnand %p2661_p12, %p2647_p0  ;;  %p2669_p13 = scmp.lt.s32.totalorder %s2667_s17, %s2660_s9 }
  0x58   : > { %p2664_p5 = pneg %p2663_p2  ;;  %p2670_p6 = por %p2669_p13, %p2668_p4 }
  0x5a   : > { %p2671_p10 = pnand %p2670_p6, %p2664_p5 }
  0x5c   : > { %2674 = shalt.err (!%p2671_p10)
}
  0x5d   : > { %s2752_s21 = smov 128   ;;  %s2753_s26 = smov 8  }
  0x5e   : > { %2464 = dma.hbm_to_vmem [thread:$0]  (!%p2910_p11), %s2917_s24, 1664, %s2919_s27, %s2921_s28, %s2752_s21, %s2752_s21, %s2753_s26  }
  0x5f   : > { %179 = sbr.rel (%p2819_p8) target bundleno = 553 (0x229), region = 32  ;;  %s2952_s22 = sand.u32 (!%p2819_p8), 1, %s2737_s13  }
  0x60   : > { %s2439_s29 = smul.u32 (!%p2819_p8), 104, %s2952_s22  ;;  %s182_s30 = scalar_lea.sflag (!%p2819_p8), [#allocation3], %s2952_s22 }
  0x61   : > { %p3329_p4 = scmp.ne.s32.totalorder (!%p2819_p8), %s3322_s18, 0 }
  0x62   : > { %s2956_s4 = scalar_lea.vmem (!%p2819_p8), [#allocation2], %s2439_s29 }
  0x66   : > { %2720 = dma.done.wait (%p3329_p4), %s182_s30, 1664  }
  0x67   : > { %2722 = vsyncadd (%p3329_p4), %s182_s30, 4294965632  ;;  %p3330_p5 = scmp.eq.s32.totalorder %s2800_s16, 0 }
  0x69   : > { %2724 = dma.done.wait (%p3330_p5), [#allocation6], 9232   ;;  %p3331_p8 = pmov %p3330_p5 }
  0x6a   : > { %v2754_v0 = vmov 0.0   ;;  %vm2755_vm0 = vmmov 0   ;;  %v2517_v1 = vld [vmem:[#allocation5 + $0x40] sm:$0xff]   ;;  %v2519_v3 = vld [vmem:[#allocation5 + $0x48] sm:$0xff]   ;;  %v2521_v5 = vld [vmem:[#allocation5 + $0x50] sm:$0xff]   ;;  %s2440_s18 = smul.u32 40, %s2952_s22 }
  0x6b   : > { %2726 = vsyncadd (%p3331_p8), [#allocation6], 4294958064  ;;  %2097 = vmatprep.subr.bf16.mxu0 %v2754_v0  ;;  %2133 = vmatprep.subr.bf16.mxu1 %v2754_v0  ;;  %v2518_v2 = vld [vmem:[#allocation5] sm:$0xff]   ;;  %v2520_v4 = vld [vmem:[#allocation5 + $0x8] sm:$0xff]   ;;  %s2441_s24 = smul.u32 640, %s2800_s16  ;;  %s1741_s6 = scalar_lea.sflag [#allocation4], %s2952_s22 }
  0x6c   : > { %2113 = vmatprep.mubr.msk.bf16.mxu0 %vm2755_vm0, %v2754_v0  ;;  %2149 = vmatprep.mubr.msk.bf16.mxu1 %vm2755_vm0, %v2754_v0  ;;  %v2522_v6 = vld [vmem:[#allocation5 + $0x10] sm:$0xff]   ;;  %v2523_v7 = vld [vmem:[#allocation5 + $0x58] sm:$0xff]   ;;  %v2525_v9 = vld [vmem:[#allocation5 + $0x60] sm:$0xff]   ;;  %s3254_s20 = scalar_lea.vmem [#allocation8], %s2440_s18  ;;  %p3332_p0 = scmp.ne.s32.totalorder %s3327_s7, 0 }
  0x6d   : > { %2098 = vmatpush3.bf16.msra.mxu0 %v2517_v1  ;;  %2134 = vmatpush3.bf16.msra.mxu1 %v2518_v2  ;;  %v2524_v8 = vld [vmem:[#allocation5 + $0x18] sm:$0xff]   ;;  %v2526_v10 = vld [vmem:[#allocation5 + $0x20] sm:$0xff]   ;;  %v2527_v11 = vld [vmem:[#allocation5 + $0x68] sm:$0xff]   ;;  %s1754_s11 = sshll.u32 %s3254_s20, 4  ;;  %s3270_s23 = scalar_lea.hbm %s3318_s3, %s2441_s24  ;;  %s3265_s11 = int_to_ptr.vmem [resolvable:$true] %s1754_s11 }
  0x6e   : > { %2099 = vmatprep.subr.bf16.mxu0 %v2754_v0  ;;  %2135 = vmatprep.subr.bf16.mxu1 %v2754_v0  ;;  %v2528_v12 = vld [vmem:[#allocation5 + $0x28] sm:$0xff]   ;;  %v2529_v13 = vld [vmem:[#allocation5 + $0x70] sm:$0xff]   ;;  %v2531_v15 = vld [vmem:[#allocation5 + $0x78] sm:$0xff]   ;;  %s2675_s9 = scalar_lea.vmem %s3265_s11, 640  ;;  %s2756_s16 = smov [#allocation8]  }
  0x6f   : > { %v2530_v14 = vld [vmem:[#allocation5 + $0x30] sm:$0xff]   ;;  %v2532_v17 = vld [vmem:[#allocation5 + $0x38] sm:$0xff]   ;;  %v2533_v23 = vld [vmem:[#allocation5 + $0x80] sm:$0xff]   ;;  %p2676_p11 = scmp.ne.s32.totalorder %s3265_s11, %s2675_s9  ;;  %s2679_s10 = sshll.u32 %s2756_s16, 4  ;;  %s2680_s10 = int_to_ptr.vmem [resolvable:$false] %s2679_s10 }
  0x70   : > { %v248_v16 = vld [vmem:[%s2956_s4 + $0x1] sm:$0xff]  ;;  %v249_v18 = vld [vmem:[%s2956_s4 + $0x9] sm:$0xff]  ;;  %v250_v26 = vld [vmem:[%s2956_s4 + $0x11] sm:$0xff]  ;;  %s2681_s25 = scalar_lea.vmem %s2680_s10, 1280  ;;  %p2682_p7 = scmp.lt.s32.totalorder %s3265_s11, %s2680_s10 }
  0x71   : > { %2100 = vmatpush3.bf16.msra.mxu0 %v2519_v3  ;;  %2136 = vmatpush3.bf16.msra.mxu1 %v2520_v4  ;;  %v217_v19 = vld [vmem:[%s2956_s4] sm:$0xff]  ;;  %v218_v20 = vld [vmem:[%s2956_s4 + $0x8] sm:$0xff]  ;;  %v258_v21 = vpack.c.bf16 %v249_v18, %v248_v16  ;;  %v2534_v25 = vld [vmem:[#allocation5 + $0x88] sm:$0xff]   ;;  %p2677_p1 = pnand %p2676_p11, %p3332_p0  ;;  %p2683_p9 = scmp.lt.s32.totalorder %s2681_s25, %s2675_s9 }
  0x72   : > { %2101 = vmatprep.subr.bf16.mxu0 %v2754_v0  ;;  %2137 = vmatprep.subr.bf16.mxu1 %v2754_v0  ;;  %v227_v22 = vpack.c.bf16 %v218_v20, %v217_v19  ;;  %v2535_v24 = vld [vmem:[#allocation5 + $0xc0] sm:$0xff]   ;;  %v251_v27 = vld [vmem:[%s2956_s4 + $0x19] sm:$0xff] }
  0x73   : > { %v219_v28 = vld [vmem:[%s2956_s4 + $0x10] sm:$0xff]  ;;  %v220_v29 = vld [vmem:[%s2956_s4 + $0x18] sm:$0xff]  ;;  %v259_v31 = vpack.c.bf16 %v251_v27, %v250_v26  ;;  %v252_v34 = vld [vmem:[%s2956_s4 + $0x21] sm:$0xff]  ;;  %p2678_p3 = pneg %p2677_p1  ;;  %p2684_p12 = por %p2683_p9, %p2682_p7 }
  0x74   : > { %v2537_v30 = vld [vmem:[#allocation5 + $0xc8] sm:$0xff]   ;;  %v228_v32 = vpack.c.bf16 %v220_v29, %v219_v28  ;;  %v2536_v33 = vld [vmem:[#allocation5 + $0x90] sm:$0xff]   ;;  %v2538_v38 = vld [vmem:[#allocation5 + $0x98] sm:$0xff]  }
  0x75   : > { %2102 = vmatpush3.bf16.msra.mxu0 %v2521_v5  ;;  %2138 = vmatpush3.bf16.msra.mxu1 %v2522_v6  ;;  %v2539_v35 = vld [vmem:[#allocation5 + $0xd0] sm:$0xff]   ;;  %v253_v36 = vld [vmem:[%s2956_s4 + $0x29] sm:$0xff]  ;;  %p2685_p2 = pnand %p2684_p12, %p2678_p3 }
  0x76   : > { %2103 = vmatprep.subr.bf16.mxu0 %v2754_v0  ;;  %2139 = vmatprep.subr.bf16.mxu1 %v2754_v0  ;;  %v221_v37 = vld [vmem:[%s2956_s4 + $0x20] sm:$0xff]  ;;  %v222_v39 = vld [vmem:[%s2956_s4 + $0x28] sm:$0xff]  ;;  %v260_v41 = vpack.c.bf16 %v253_v36, %v252_v34  ;;  %v254_v44 = vld [vmem:[%s2956_s4 + $0x31] sm:$0xff] }
  0x77   : > { %v2541_v40 = vld [vmem:[#allocation5 + $0xd8] sm:$0xff]   ;;  %v229_v42 = vpack.c.bf16 %v222_v39, %v221_v37  ;;  %v2540_v43 = vld [vmem:[#allocation5 + $0xa0] sm:$0xff]   ;;  %v2543_v48 = vld [vmem:[#allocation5 + $0xa8] sm:$0xff]  }
  0x78   : > { %v2542_v45 = vld [vmem:[#allocation5 + $0xe0] sm:$0xff]   ;;  %v255_v46 = vld [vmem:[%s2956_s4 + $0x39] sm:$0xff] }
  0x79   : > { %2104 = vmatpush3.bf16.msra.mxu0 %v2523_v7  ;;  %2140 = vmatpush3.bf16.msra.mxu1 %v2524_v8  ;;  %v223_v47 = vld [vmem:[%s2956_s4 + $0x30] sm:$0xff]  ;;  %v224_v49 = vld [vmem:[%s2956_s4 + $0x38] sm:$0xff]  ;;  %v261_v51 = vpack.c.bf16 %v255_v46, %v254_v44  ;;  %v256_v55 = vld [vmem:[%s2956_s4 + $0x41] sm:$0xff] }
  0x7a   : > { %2105 = vmatprep.subr.bf16.mxu0 %v2754_v0  ;;  %2141 = vmatprep.subr.bf16.mxu1 %v2754_v0  ;;  %v2544_v50 = vld [vmem:[#allocation5 + $0xe8] sm:$0xff]   ;;  %v230_v52 = vpack.c.bf16 %v224_v49, %v223_v47  ;;  %v2545_v53 = vld [vmem:[#allocation5 + $0xb0] sm:$0xff]   ;;  %v226_v58 = vld [vmem:[%s2956_s4 + $0x48] sm:$0xff] }
  0x7b   : > { %v2546_v54 = vld [vmem:[#allocation5 + $0xf0] sm:$0xff]   ;;  %v257_v56 = vld [vmem:[%s2956_s4 + $0x49] sm:$0xff] }
  0x7c   : > { %v225_v57 = vld [vmem:[%s2956_s4 + $0x40] sm:$0xff]  ;;  %v262_v61 = vpack.c.bf16 %v257_v56, %v256_v55  ;;  %v523_v1 = vld [vmem:[%s2956_s4 + $0xa] sm:$0xff]  ;;  %v686_v2 = vld [vmem:[%s2956_s4 + $0x12] sm:$0xff] }
  0x7d   : > { %2106 = vmatpush3.bf16.msra.mxu0 %v2525_v9  ;;  %2142 = vmatpush3.bf16.msra.mxu1 %v2526_v10  ;;  %v2547_v59 = vld [vmem:[#allocation5 + $0xb8] sm:$0xff]   ;;  %v231_v62 = vpack.c.bf16 %v226_v58, %v225_v57  ;;  %v695_v4 = vpack.c.bf16 %v686_v2, %v523_v1  ;;  %v2549_v5 = vld [vmem:[#allocation5 + $0x100] sm:$0xff]   ;;  %v2550_v7 = vld [vmem:[#allocation5 + $0x108] sm:$0xff]  }
  0x7e   : > { %2107 = vmatprep.subr.bf16.mxu0 %v2754_v0  ;;  %2143 = vmatprep.subr.bf16.mxu1 %v2754_v0  ;;  %v2548_v60 = vld [vmem:[#allocation5 + $0xf8] sm:$0xff]   ;;  %v2551_v6 = vld [vmem:[#allocation5 + $0x140] sm:$0xff]   ;;  %v2553_v10 = vld [vmem:[#allocation5 + $0x148] sm:$0xff]  }
  0x7f   : > { %v522_v63 = vld [vmem:[%s2956_s4 + $0x2] sm:$0xff]  ;;  %v525_v8 = vld [vmem:[%s2956_s4 + $0x1a] sm:$0xff]  ;;  %v848_v37 = vld [vmem:[%s2956_s4 + $0xb] sm:$0xff] }
  0x80   : > { %v532_v3 = vpack.c.bf16 %v523_v1, %v522_v63  ;;  %v688_v9 = vld [vmem:[%s2956_s4 + $0x22] sm:$0xff]  ;;  %v2560_v26 = vld [vmem:[#allocation5 + $0x168] sm:$0xff]  }
  0x81   : > { %2108 = vmatpush3.bf16.msra.mxu0 %v2527_v11  ;;  %2144 = vmatpush3.bf16.msra.mxu1 %v2528_v12  ;;  %v533_v11 = vpack.c.bf16 %v525_v8, %v686_v2  ;;  %v696_v12 = vpack.c.bf16 %v688_v9, %v525_v8  ;;  %v2554_v16 = vld [vmem:[#allocation5 + $0x118] sm:$0xff]   ;;  %v2561_v29 = vld [vmem:[#allocation5 + $0x130] sm:$0xff]   ;;  %v2567_v44 = vld [vmem:[#allocation5 + $0x1c0] sm:$0xff]  }
  0x82   : > { %2109 = vmatprep.subr.bf16.mxu0 %v2754_v0  ;;  %2145 = vmatprep.subr.bf16.mxu1 %v2754_v0  ;;  %v2557_v18 = vld [vmem:[#allocation5 + $0x158] sm:$0xff]   ;;  %v853_v56 = vld [vmem:[%s2956_s4 + $0x33] sm:$0xff] }
  0x83   : > { %v2564_v34 = vld [vmem:[#allocation5 + $0x178] sm:$0xff]   ;;  %v2572_v63 = vld [vmem:[#allocation5 + $0x1a0] sm:$0xff]  }
  0x84   : > { %v1011_v39 = vld [vmem:[%s2956_s4 + $0xc] sm:$0xff]  ;;  %v850_v46 = vld [vmem:[%s2956_s4 + $0x1b] sm:$0xff]  ;;  %v851_v47 = vld [vmem:[%s2956_s4 + $0x23] sm:$0xff] }
  0x85   : > { %2110 = vmatpush3.bf16.msra.mxu0 %v2529_v13  ;;  %2146 = vmatpush3.bf16.msra.mxu1 %v2530_v14  ;;  %v2552_v13 = vld [vmem:[#allocation5 + $0x110] sm:$0xff]   ;;  %v852_v55 = vld [vmem:[%s2956_s4 + $0x2b] sm:$0xff] }
  0x86   : > { %2111 = vmatprep.subr.bf16.mxu0 %v2754_v0  ;;  %2147 = vmatprep.subr.bf16.mxu1 %v2754_v0  ;;  %v2555_v14 = vld [vmem:[#allocation5 + $0x150] sm:$0xff]   ;;  %v2570_v57 = vld [vmem:[#allocation5 + $0x198] sm:$0xff]   ;;  %v2574_v1 = vld [vmem:[#allocation5 + $0x1e0] sm:$0xff]  }
  0x87   : > { %v3107_v49 = vld [vmem:[%s2956_s4 + $0x24] sm:$0xff]  ;;  %v3123_v58 = vld [vmem:[%s2956_s4 + $0x2c] sm:$0xff]  ;;  %v854_v2 = vld [vmem:[%s2956_s4 + $0x3b] sm:$0xff] }
  0x89   : > { %2112 = vmatpush3.bf16.msra.mxu0 %v2531_v15  ;;  %2148 = vmatpush3.bf16.msra.mxu1 %v2532_v17  ;;  %v527_v15 = vld [vmem:[%s2956_s4 + $0x2a] sm:$0xff]  ;;  %v690_v17 = vld [vmem:[%s2956_s4 + $0x32] sm:$0xff] }
  0x8a   : > { %2169 = vmatprep.subr.bf16.mxu0 %v2754_v0  ;;  %2205 = vmatprep.subr.bf16.mxu1 %v2754_v0  ;;  %v534_v19 = vpack.c.bf16 %v527_v15, %v688_v9  ;;  %v697_v20 = vpack.c.bf16 %v690_v17, %v527_v15  ;;  %v3162_v15 = vld [vmem:[%s2956_s4 + $0x54] sm:$0xff] }
  0x8c   : > { %2114 = vmatmul.mubr.bf16.vlgmr.msra.gmra.mrb[0].mxu0 %v258_v21  ;;  %2150 = vmatmul.mubr.bf16.vlgmr.msra.gmra.mrb[0].mxu1 %v227_v22  ;;  %v2556_v21 = vld [vmem:[#allocation5 + $0x120] sm:$0xff]  }
  0x8d   : > { %2170 = vmatpush3.bf16.msra.mxu0 %v2533_v23  ;;  %2117 = vmatprep.mubr.msk.bf16.mxu0 %vm2755_vm0, %v2754_v0  ;;  %v2558_v22 = vld [vmem:[#allocation5 + $0x160] sm:$0xff]   ;;  %v529_v23 = vld [vmem:[%s2956_s4 + $0x3a] sm:$0xff] }
  0x8e   : > { %2171 = vmatprep.subr.bf16.mxu0 %v2754_v0  ;;  %2153 = vmatprep.mubr.msk.bf16.mxu1 %vm2755_vm0, %v2754_v0  ;;  %v535_v27 = vpack.c.bf16 %v529_v23, %v690_v17  ;;  %v2580_v17 = vld [vmem:[#allocation5 + $0x1f8] sm:$0xff]  }
  0x8f   : > { %2206 = vmatpush3.bf16.msra.mxu1 %v2535_v24  ;;  %v2559_v24 = vld [vmem:[#allocation5 + $0x128] sm:$0xff]  }
  0x90   : > { %2207 = vmatprep.subr.bf16.mxu1 %v2754_v0 }
  0x91   : > { %2172 = vmatpush3.bf16.msra.mxu0 %v2534_v25  ;;  %v692_v25 = vld [vmem:[%s2956_s4 + $0x42] sm:$0xff] }
  0x92   : > { %2173 = vmatprep.subr.bf16.mxu0 %v2754_v0  ;;  %v698_v28 = vpack.c.bf16 %v692_v25, %v529_v23 }
  0x93   : > { %2208 = vmatpush3.bf16.msra.mxu1 %v2537_v30  ;;  %v2562_v30 = vld [vmem:[#allocation5 + $0x170] sm:$0xff]  }
  0x94   : > { %2118 = vmatmul.mubr.bf16.gmra.mrb[4].mxu0 %v259_v31  ;;  %2209 = vmatprep.subr.bf16.mxu1 %v2754_v0  ;;  %v531_v31 = vld [vmem:[%s2956_s4 + $0x4a] sm:$0xff] }
  0x95   : > { %2154 = vmatmul.mubr.bf16.gmra.mrb[4].mxu1 %v228_v32  ;;  %2174 = vmatpush3.bf16.msra.mxu0 %v2536_v33  ;;  %v694_v32 = vld [vmem:[%s2956_s4 + $0x52] sm:$0xff]  ;;  %v2563_v33 = vld [vmem:[#allocation5 + $0x138] sm:$0xff]  }
  0x96   : > { %2121 = vmatprep.mubr.msk.bf16.mxu0 %vm2755_vm0, %v2754_v0  ;;  %2157 = vmatprep.mubr.msk.bf16.mxu1 %vm2755_vm0, %v2754_v0  ;;  %v699_v36 = vpack.c.bf16 %v694_v32, %v531_v31  ;;  %v1341_v32 = vld [vmem:[%s2956_s4 + $0x35] sm:$0xff] }
  0x97   : > { %2175 = vmatprep.subr.bf16.mxu0 %v2754_v0  ;;  %2210 = vmatpush3.bf16.msra.mxu1 %v2539_v35  ;;  %v536_v35 = vpack.c.bf16 %v531_v31, %v692_v25  ;;  %v2582_v25 = vld [vmem:[#allocation5 + $0x208] sm:$0xff]   ;;  %v2584_v31 = vld [vmem:[#allocation5 + $0x218] sm:$0xff]  }
  0x98   : > { %2211 = vmatprep.subr.bf16.mxu1 %v2754_v0 }
  0x99   : > { %2176 = vmatpush3.bf16.msra.mxu0 %v2538_v38  ;;  %v849_v38 = vld [vmem:[%s2956_s4 + $0x13] sm:$0xff] }
  0x9a   : > { %2177 = vmatprep.subr.bf16.mxu0 %v2754_v0 }
  0x9b   : > { %2212 = vmatpush3.bf16.msra.mxu1 %v2541_v40  ;;  %v3095_v40 = vld [vmem:[%s2956_s4 + $0x14] sm:$0xff] }
  0x9c   : > { %2122 = vmatmul.mubr.bf16.gmra.mrb[8].mxu0 %v260_v41  ;;  %2213 = vmatprep.subr.bf16.mxu1 %v2754_v0  ;;  %v858_v41 = vpack.c.bf16 %v849_v38, %v848_v37  ;;  %v2586_v37 = vld [vmem:[#allocation5 + $0x228] sm:$0xff]   ;;  %v1343_v38 = vld [vmem:[%s2956_s4 + $0x45] sm:$0xff] }
  0x9d   : > { %2158 = vmatmul.mubr.bf16.gmra.mrb[8].mxu1 %v229_v42  ;;  %2178 = vmatpush3.bf16.msra.mxu0 %v2540_v43  ;;  %v1021_v42 = vpack.c.bf16 %v3095_v40, %v1011_v39  ;;  %v2565_v43 = vld [vmem:[#allocation5 + $0x180] sm:$0xff]  }
  0x9e   : > { %2125 = vmatprep.mubr.msk.bf16.mxu0 %vm2755_vm0, %v2754_v0  ;;  %2161 = vmatprep.mubr.msk.bf16.mxu1 %vm2755_vm0, %v2754_v0  ;;  %v1344_v39 = vld [vmem:[%s2956_s4 + $0x4d] sm:$0xff] }
  0x9f   : > { %2179 = vmatprep.subr.bf16.mxu0 %v2754_v0  ;;  %2214 = vmatpush3.bf16.msra.mxu1 %v2542_v45  ;;  %v2566_v45 = vld [vmem:[#allocation5 + $0x188] sm:$0xff]  }
  0xa0   : > { %2215 = vmatprep.subr.bf16.mxu1 %v2754_v0 }
  0xa1   : > { %2180 = vmatpush3.bf16.msra.mxu0 %v2543_v48  ;;  %v3104_v48 = vld [vmem:[%s2956_s4 + $0x1c] sm:$0xff] }
  0xa2   : > { %2181 = vmatprep.subr.bf16.mxu0 %v2754_v0 }
  0xa3   : > { %2216 = vmatpush3.bf16.msra.mxu1 %v2544_v50  ;;  %v2569_v50 = vld [vmem:[#allocation5 + $0x1c8] sm:$0xff]  }
  0xa4   : > { %2126 = vmatmul.mubr.bf16.gmra.mrb[12].mxu0 %v261_v51  ;;  %2217 = vmatprep.subr.bf16.mxu1 %v2754_v0  ;;  %v859_v51 = vpack.c.bf16 %v851_v47, %v850_v46  ;;  %v2588_v46 = vld [vmem:[#allocation5 + $0x238] sm:$0xff]  }
  0xa5   : > { %2162 = vmatmul.mubr.bf16.gmra.mrb[12].mxu1 %v230_v52  ;;  %2129 = vmatprep.mubr.msk.bf16.mxu0 %vm2755_vm0, %v2754_v0  ;;  %v1022_v52 = vpack.c.bf16 %v3107_v49, %v3104_v48 }
  0xa6   : > { %2165 = vmatprep.mubr.msk.bf16.mxu1 %vm2755_vm0, %v2754_v0  ;;  %2182 = vmatpush3.bf16.msra.mxu0 %v2545_v53  ;;  %v2568_v53 = vld [vmem:[#allocation5 + $0x190] sm:$0xff]  }
  0xa7   : > { %2218 = vmatpush3.bf16.msra.mxu1 %v2546_v54  ;;  %2183 = vmatprep.subr.bf16.mxu0 %v2754_v0  ;;  %v2571_v54 = vld [vmem:[#allocation5 + $0x1d0] sm:$0xff]  }
  0xa8   : > { %2219 = vmatprep.subr.bf16.mxu1 %v2754_v0 }
  0xaa   : > { %2184 = vmatpush3.bf16.msra.mxu0 %v2547_v59  ;;  %v3126_v59 = vld [vmem:[%s2956_s4 + $0x34] sm:$0xff] }
  0xab   : > { %2220 = vmatpush3.bf16.msra.mxu1 %v2548_v60  ;;  %2241 = vmatprep.subr.bf16.mxu0 %v2754_v0  ;;  %v2573_v60 = vld [vmem:[#allocation5 + $0x1d8] sm:$0xff]  }
  0xac   : > { %2130 = vmatmul.mubr.bf16.gmra.mrb[16].mxu0 %v262_v61  ;;  %2277 = vmatprep.subr.bf16.mxu1 %v2754_v0  ;;  %v860_v61 = vpack.c.bf16 %v853_v56, %v852_v55  ;;  %v1502_v55 = vld [vmem:[%s2956_s4 + $0x26] sm:$0xff]  ;;  %v1503_v56 = vld [vmem:[%s2956_s4 + $0x2e] sm:$0xff] }
  0xad   : > { %2166 = vmatmul.mubr.bf16.gmra.mrb[16].mxu1 %v231_v62  ;;  %2185 = vmatprep.mubr.msk.bf16.mxu0 %vm2755_vm0, %v2754_v0  ;;  %v1023_v62 = vpack.c.bf16 %v3126_v59, %v3123_v58 }
  0xae   : > { %2221 = vmatprep.mubr.msk.bf16.mxu1 %vm2755_vm0, %v2754_v0 }
  0xb4   : > { %2186 = vmatmul.mubr.bf16.vlgmr.msra.gmra.mrb[20].mxu0 %v532_v3  ;;  %v855_v3 = vld [vmem:[%s2956_s4 + $0x43] sm:$0xff] }
  0xb5   : > { %2222 = vmatmul.mubr.bf16.vlgmr.msra.gmra.mrb[20].mxu1 %v695_v4  ;;  %2242 = vmatpush3.bf16.msra.mxu0 %v2549_v5  ;;  %v2575_v4 = vld [vmem:[#allocation5 + $0x1a8] sm:$0xff]   ;;  %v861_v8 = vpack.c.bf16 %v855_v3, %v854_v2 }
  0xb6   : > { %2243 = vmatprep.subr.bf16.mxu0 %v2754_v0  ;;  %2189 = vmatprep.mubr.msk.bf16.mxu0 %vm2755_vm0, %v2754_v0  ;;  %v3141_v5 = vld [vmem:[%s2956_s4 + $0x3c] sm:$0xff] }
  0xb7   : > { %2225 = vmatprep.mubr.msk.bf16.mxu1 %vm2755_vm0, %v2754_v0  ;;  %2278 = vmatpush3.bf16.msra.mxu1 %v2551_v6  ;;  %v3144_v6 = vld [vmem:[%s2956_s4 + $0x44] sm:$0xff] }
  0xb8   : > { %2279 = vmatprep.subr.bf16.mxu1 %v2754_v0  ;;  %v1024_v9 = vpack.c.bf16 %v3144_v6, %v3141_v5 }
  0xb9   : > { %2244 = vmatpush3.bf16.msra.mxu0 %v2550_v7  ;;  %v2576_v7 = vld [vmem:[#allocation5 + $0x1e8] sm:$0xff]  }
  0xba   : > { %2245 = vmatprep.subr.bf16.mxu0 %v2754_v0 }
  0xbb   : > { %2280 = vmatpush3.bf16.msra.mxu1 %v2553_v10  ;;  %v2577_v10 = vld [vmem:[#allocation5 + $0x1b0] sm:$0xff]  }
  0xbc   : > { %2190 = vmatmul.mubr.bf16.gmra.mrb[24].mxu0 %v533_v11  ;;  %2281 = vmatprep.subr.bf16.mxu1 %v2754_v0  ;;  %v2578_v11 = vld [vmem:[#allocation5 + $0x1f0] sm:$0xff]  }
  0xbd   : > { %2226 = vmatmul.mubr.bf16.gmra.mrb[24].mxu1 %v696_v12  ;;  %2246 = vmatpush3.bf16.msra.mxu0 %v2552_v13  ;;  %v856_v12 = vld [vmem:[%s2956_s4 + $0x4b] sm:$0xff]  ;;  %v857_v13 = vld [vmem:[%s2956_s4 + $0x53] sm:$0xff] }
  0xbe   : > { %2193 = vmatprep.mubr.msk.bf16.mxu0 %vm2755_vm0, %v2754_v0  ;;  %2229 = vmatprep.mubr.msk.bf16.mxu1 %vm2755_vm0, %v2754_v0 }
  0xbf   : > { %2247 = vmatprep.subr.bf16.mxu0 %v2754_v0  ;;  %2282 = vmatpush3.bf16.msra.mxu1 %v2555_v14  ;;  %v3159_v14 = vld [vmem:[%s2956_s4 + $0x4c] sm:$0xff] }
  0xc0   : > { %2283 = vmatprep.subr.bf16.mxu1 %v2754_v0 }
  0xc1   : > { %2248 = vmatpush3.bf16.msra.mxu0 %v2554_v16  ;;  %v2579_v16 = vld [vmem:[#allocation5 + $0x1b8] sm:$0xff]  }
  0xc2   : > { %2249 = vmatprep.subr.bf16.mxu0 %v2754_v0 }
  0xc3   : > { %2284 = vmatpush3.bf16.msra.mxu1 %v2557_v18  ;;  %v862_v18 = vpack.c.bf16 %v857_v13, %v856_v12 }
  0xc4   : > { %2194 = vmatmul.mubr.bf16.gmra.mrb[28].mxu0 %v534_v19  ;;  %2285 = vmatprep.subr.bf16.mxu1 %v2754_v0  ;;  %v1025_v19 = vpack.c.bf16 %v3162_v15, %v3159_v14 }
  0xc5   : > { %2230 = vmatmul.mubr.bf16.gmra.mrb[28].mxu1 %v697_v20  ;;  %2250 = vmatpush3.bf16.msra.mxu0 %v2556_v21  ;;  %v1337_v20 = vld [vmem:[%s2956_s4 + $0x15] sm:$0xff]  ;;  %v1338_v21 = vld [vmem:[%s2956_s4 + $0x1d] sm:$0xff] }
  0xc6   : > { %2197 = vmatprep.mubr.msk.bf16.mxu0 %vm2755_vm0, %v2754_v0  ;;  %2233 = vmatprep.mubr.msk.bf16.mxu1 %vm2755_vm0, %v2754_v0  ;;  %v1347_v23 = vpack.c.bf16 %v1338_v21, %v1337_v20 }
  0xc7   : > { %2251 = vmatprep.subr.bf16.mxu0 %v2754_v0  ;;  %2286 = vmatpush3.bf16.msra.mxu1 %v2558_v22  ;;  %v1184_v22 = vpack.c.bf16 %v3104_v48, %v3095_v40  ;;  %v1187_v40 = vpack.c.bf16 %v3159_v14, %v3144_v6 }
  0xc8   : > { %2287 = vmatprep.subr.bf16.mxu1 %v2754_v0 }
  0xc9   : > { %2252 = vmatpush3.bf16.msra.mxu0 %v2559_v24  ;;  %v2581_v24 = vld [vmem:[#allocation5 + $0x200] sm:$0xff]  }
  0xca   : > { %2253 = vmatprep.subr.bf16.mxu0 %v2754_v0 }
  0xcb   : > { %2288 = vmatpush3.bf16.msra.mxu1 %v2560_v26  ;;  %v1339_v26 = vld [vmem:[%s2956_s4 + $0x25] sm:$0xff] }
  0xcc   : > { %2198 = vmatmul.mubr.bf16.gmra.mrb[32].mxu0 %v535_v27  ;;  %2289 = vmatprep.subr.bf16.mxu1 %v2754_v0  ;;  %v1340_v27 = vld [vmem:[%s2956_s4 + $0x2d] sm:$0xff] }
  0xcd   : > { %2234 = vmatmul.mubr.bf16.gmra.mrb[32].mxu1 %v698_v28  ;;  %2201 = vmatprep.mubr.msk.bf16.mxu0 %vm2755_vm0, %v2754_v0  ;;  %v1185_v28 = vpack.c.bf16 %v3123_v58, %v3107_v49  ;;  %v1500_v49 = vld [vmem:[%s2956_s4 + $0x16] sm:$0xff]  ;;  %v1509_v58 = vld [vmem:[%s2956_s4 + $0x5e] sm:$0xff] }
  0xce   : > { %2237 = vmatprep.mubr.msk.bf16.mxu1 %vm2755_vm0, %v2754_v0  ;;  %2254 = vmatpush3.bf16.msra.mxu0 %v2561_v29  ;;  %v1348_v29 = vpack.c.bf16 %v1340_v27, %v1339_v26 }
  0xcf   : > { %2290 = vmatpush3.bf16.msra.mxu1 %v2562_v30  ;;  %2255 = vmatprep.subr.bf16.mxu0 %v2754_v0  ;;  %v2583_v30 = vld [vmem:[#allocation5 + $0x210] sm:$0xff]  }
  0xd0   : > { %2291 = vmatprep.subr.bf16.mxu1 %v2754_v0 }
  0xd2   : > { %2256 = vmatpush3.bf16.msra.mxu0 %v2563_v33  ;;  %v1342_v33 = vld [vmem:[%s2956_s4 + $0x3d] sm:$0xff] }
  0xd3   : > { %2292 = vmatpush3.bf16.msra.mxu1 %v2564_v34  ;;  %2313 = vmatprep.subr.bf16.mxu0 %v2754_v0  ;;  %v1186_v34 = vpack.c.bf16 %v3141_v5, %v3126_v59  ;;  %v1511_v59 = vpack.c.bf16 %v1503_v56, %v1502_v55 }
  0xd4   : > { %2202 = vmatmul.mubr.bf16.gmra.mrb[36].mxu0 %v536_v35  ;;  %2349 = vmatprep.subr.bf16.mxu1 %v2754_v0  ;;  %v1349_v35 = vpack.c.bf16 %v1342_v33, %v1341_v32 }
  0xd5   : > { %2238 = vmatmul.mubr.bf16.gmra.mrb[36].mxu1 %v699_v36  ;;  %2257 = vmatprep.mubr.msk.bf16.mxu0 %vm2755_vm0, %v2754_v0  ;;  %v2585_v36 = vld [vmem:[#allocation5 + $0x220] sm:$0xff]  }
  0xd6   : > { %2293 = vmatprep.mubr.msk.bf16.mxu1 %vm2755_vm0, %v2754_v0 }
  0xdc   : > { %2258 = vmatmul.mubr.bf16.vlgmr.msra.gmra.mrb[40].mxu0 %v858_v41  ;;  %v1350_v41 = vpack.c.bf16 %v1344_v39, %v1343_v38 }
  0xdd   : > { %2294 = vmatmul.mubr.bf16.vlgmr.msra.gmra.mrb[40].mxu1 %v1021_v42  ;;  %2314 = vmatpush3.bf16.msra.mxu0 %v2565_v43  ;;  %v2587_v42 = vld [vmem:[#allocation5 + $0x230] sm:$0xff]  }
  0xde   : > { %2315 = vmatprep.subr.bf16.mxu0 %v2754_v0  ;;  %2261 = vmatprep.mubr.msk.bf16.mxu0 %vm2755_vm0, %v2754_v0  ;;  %v1183_v43 = vld [vmem:[%s2956_s4 + $0x5c] sm:$0xff] }
  0xdf   : > { %2297 = vmatprep.mubr.msk.bf16.mxu1 %vm2755_vm0, %v2754_v0  ;;  %2350 = vmatpush3.bf16.msra.mxu1 %v2567_v44  ;;  %v1345_v44 = vld [vmem:[%s2956_s4 + $0x55] sm:$0xff]  ;;  %v1188_v47 = vpack.c.bf16 %v1183_v43, %v3162_v15 }
  0xe0   : > { %2351 = vmatprep.subr.bf16.mxu1 %v2754_v0 }
  0xe1   : > { %2316 = vmatpush3.bf16.msra.mxu0 %v2566_v45  ;;  %v1346_v45 = vld [vmem:[%s2956_s4 + $0x5d] sm:$0xff] }
  0xe2   : > { %2317 = vmatprep.subr.bf16.mxu0 %v2754_v0  ;;  %v1351_v48 = vpack.c.bf16 %v1346_v45, %v1345_v44 }
  0xe3   : > { %2352 = vmatpush3.bf16.msra.mxu1 %v2569_v50  ;;  %v1501_v50 = vld [vmem:[%s2956_s4 + $0x1e] sm:$0xff] }
  0xe4   : > { %2262 = vmatmul.mubr.bf16.gmra.mrb[44].mxu0 %v859_v51  ;;  %2353 = vmatprep.subr.bf16.mxu1 %v2754_v0  ;;  %v1506_v51 = vld [vmem:[%s2956_s4 + $0x46] sm:$0xff] }
  0xe5   : > { %2298 = vmatmul.mubr.bf16.gmra.mrb[44].mxu1 %v1022_v52  ;;  %2318 = vmatpush3.bf16.msra.mxu0 %v2568_v53  ;;  %v1507_v52 = vld [vmem:[%s2956_s4 + $0x4e] sm:$0xff]  ;;  %v1510_v53 = vpack.c.bf16 %v1501_v50, %v1500_v49 }
  0xe6   : > { %2265 = vmatprep.mubr.msk.bf16.mxu0 %vm2755_vm0, %v2754_v0  ;;  %2301 = vmatprep.mubr.msk.bf16.mxu1 %vm2755_vm0, %v2754_v0 }
  0xe7   : > { %2319 = vmatprep.subr.bf16.mxu0 %v2754_v0  ;;  %2354 = vmatpush3.bf16.msra.mxu1 %v2571_v54  ;;  %v1513_v54 = vpack.c.bf16 %v1507_v52, %v1506_v51 }
  0xe8   : > { %2355 = vmatprep.subr.bf16.mxu1 %v2754_v0 }
  0xe9   : > { %2320 = vmatpush3.bf16.msra.mxu0 %v2570_v57  ;;  %v1508_v57 = vld [vmem:[%s2956_s4 + $0x56] sm:$0xff] }
  0xea   : > { %2321 = vmatprep.subr.bf16.mxu0 %v2754_v0 }
  0xeb   : > { %2356 = vmatpush3.bf16.msra.mxu1 %v2573_v60  ;;  %v1514_v60 = vpack.c.bf16 %v1509_v58, %v1508_v57 }
  0xec   : > { %2266 = vmatmul.mubr.bf16.gmra.mrb[48].mxu0 %v860_v61  ;;  %2357 = vmatprep.subr.bf16.mxu1 %v2754_v0  ;;  %v1504_v61 = vld [vmem:[%s2956_s4 + $0x36] sm:$0xff] }
  0xed   : > { %2302 = vmatmul.mubr.bf16.gmra.mrb[48].mxu1 %v1023_v62  ;;  %2322 = vmatpush3.bf16.msra.mxu0 %v2572_v63  ;;  %v1505_v62 = vld [vmem:[%s2956_s4 + $0x3e] sm:$0xff] }
  0xee   : > { %2269 = vmatprep.mubr.msk.bf16.mxu0 %vm2755_vm0, %v2754_v0  ;;  %2305 = vmatprep.mubr.msk.bf16.mxu1 %vm2755_vm0, %v2754_v0  ;;  %v1512_v63 = vpack.c.bf16 %v1505_v62, %v1504_v61 }
  0xef   : > { %2323 = vmatprep.subr.bf16.mxu0 %v2754_v0  ;;  %2358 = vmatpush3.bf16.msra.mxu1 %v2574_v1 }
  0xf0   : > { %2359 = vmatprep.subr.bf16.mxu1 %v2754_v0 }
  0xf1   : > { %2324 = vmatpush3.bf16.msra.mxu0 %v2575_v4 }
  0xf2   : > { %2325 = vmatprep.subr.bf16.mxu0 %v2754_v0 }
  0xf3   : > { %2360 = vmatpush3.bf16.msra.mxu1 %v2576_v7 }
  0xf4   : > { %2270 = vmatmul.mubr.bf16.gmra.mrb[52].mxu0 %v861_v8  ;;  %2361 = vmatprep.subr.bf16.mxu1 %v2754_v0 }
  0xf5   : > { %2306 = vmatmul.mubr.bf16.gmra.mrb[52].mxu1 %v1024_v9  ;;  %2273 = vmatprep.mubr.msk.bf16.mxu0 %vm2755_vm0, %v2754_v0 }
  0xf6   : > { %2309 = vmatprep.mubr.msk.bf16.mxu1 %vm2755_vm0, %v2754_v0  ;;  %2326 = vmatpush3.bf16.msra.mxu0 %v2577_v10 }
  0xf7   : > { %2362 = vmatpush3.bf16.msra.mxu1 %v2578_v11  ;;  %2327 = vmatprep.subr.bf16.mxu0 %v2754_v0 }
  0xf8   : > { %2363 = vmatprep.subr.bf16.mxu1 %v2754_v0 }
  0xfa   : > { %2328 = vmatpush3.bf16.msra.mxu0 %v2579_v16 }
  0xfb   : > { %2364 = vmatpush3.bf16.msra.mxu1 %v2580_v17  ;;  %2385 = vmatprep.subr.bf16.mxu0 %v2754_v0 }
  0xfc   : > { %2274 = vmatmul.mubr.bf16.gmra.mrb[56].mxu0 %v862_v18  ;;  %2421 = vmatprep.subr.bf16.mxu1 %v2754_v0 }
  0xfd   : > { %2310 = vmatmul.mubr.bf16.gmra.mrb[56].mxu1 %v1025_v19  ;;  %2329 = vmatprep.mubr.msk.bf16.mxu0 %vm2755_vm0, %v2754_v0 }
  0xfe   : > { %2365 = vmatprep.mubr.msk.bf16.mxu1 %vm2755_vm0, %v2754_v0 }
 0x104   : > { %2330 = vmatmul.mubr.bf16.vlgmr.msra.gmra.mrb[60].mxu0 %v1184_v22 }
 0x105   : > { %2366 = vmatmul.mubr.bf16.vlgmr.msra.gmra.mrb[60].mxu1 %v1347_v23  ;;  %2386 = vmatpush3.bf16.msra.mxu0 %v2581_v24 }
 0x106   : > { %2387 = vmatprep.subr.bf16.mxu0 %v2754_v0  ;;  %2333 = vmatprep.mubr.msk.bf16.mxu0 %vm2755_vm0, %v2754_v0 }
 0x107   : > { %2369 = vmatprep.mubr.msk.bf16.mxu1 %vm2755_vm0, %v2754_v0  ;;  %2429 = vmatpush3.bf16.msra.mxu1 %v2581_v24 }
 0x108   : > { %2422 = vmatprep.subr.bf16.mxu1 %v2754_v0 }
 0x109   : > { %2388 = vmatpush3.bf16.msra.mxu0 %v2582_v25 }
 0x10a   : > { %2389 = vmatprep.subr.bf16.mxu0 %v2754_v0 }
 0x10b   : > { %2430 = vmatpush3.bf16.msra.mxu1 %v2582_v25 }
 0x10c   : > { %2334 = vmatmul.mubr.bf16.gmra.mrb[64].mxu0 %v1185_v28  ;;  %2423 = vmatprep.subr.bf16.mxu1 %v2754_v0 }
 0x10d   : > { %2370 = vmatmul.mubr.bf16.gmra.mrb[64].mxu1 %v1348_v29  ;;  %2390 = vmatpush3.bf16.msra.mxu0 %v2583_v30 }
 0x10e   : > { %2337 = vmatprep.mubr.msk.bf16.mxu0 %vm2755_vm0, %v2754_v0  ;;  %2373 = vmatprep.mubr.msk.bf16.mxu1 %vm2755_vm0, %v2754_v0 }
 0x10f   : > { %2391 = vmatprep.subr.bf16.mxu0 %v2754_v0  ;;  %2431 = vmatpush3.bf16.msra.mxu1 %v2583_v30 }
 0x110   : > { %2424 = vmatprep.subr.bf16.mxu1 %v2754_v0 }
 0x111   : > { %2392 = vmatpush3.bf16.msra.mxu0 %v2584_v31 }
 0x112   : > { %2393 = vmatprep.subr.bf16.mxu0 %v2754_v0 }
 0x113   : > { %2432 = vmatpush3.bf16.msra.mxu1 %v2584_v31 }
 0x114   : > { %2338 = vmatmul.mubr.bf16.gmra.mrb[68].mxu0 %v1186_v34  ;;  %2425 = vmatprep.subr.bf16.mxu1 %v2754_v0 }
 0x115   : > { %2374 = vmatmul.mubr.bf16.gmra.mrb[68].mxu1 %v1349_v35  ;;  %2394 = vmatpush3.bf16.msra.mxu0 %v2585_v36 }
 0x116   : > { %2341 = vmatprep.mubr.msk.bf16.mxu0 %vm2755_vm0, %v2754_v0  ;;  %2377 = vmatprep.mubr.msk.bf16.mxu1 %vm2755_vm0, %v2754_v0 }
 0x117   : > { %2433 = vmatpush3.bf16.msra.mxu1 %v2585_v36  ;;  %2395 = vmatprep.subr.bf16.mxu0 %v2754_v0 }
 0x118   : > { %2426 = vmatprep.subr.bf16.mxu1 %v2754_v0 }
 0x119   : > { %2396 = vmatpush3.bf16.msra.mxu0 %v2586_v37 }
 0x11a   : > { %2397 = vmatprep.subr.bf16.mxu0 %v2754_v0 }
 0x11b   : > { %2434 = vmatpush3.bf16.msra.mxu1 %v2586_v37 }
 0x11c   : > { %2342 = vmatmul.mubr.bf16.gmra.mrb[72].mxu0 %v1187_v40  ;;  %2427 = vmatprep.subr.bf16.mxu1 %v2754_v0 }
 0x11d   : > { %2378 = vmatmul.mubr.bf16.gmra.mrb[72].mxu1 %v1350_v41  ;;  %2345 = vmatprep.mubr.msk.bf16.mxu0 %vm2755_vm0, %v2754_v0 }
 0x11e   : > { %2381 = vmatprep.mubr.msk.bf16.mxu1 %vm2755_vm0, %v2754_v0  ;;  %2398 = vmatpush3.bf16.msra.mxu0 %v2587_v42 }
 0x11f   : > { %2435 = vmatpush3.bf16.msra.mxu1 %v2587_v42  ;;  %2399 = vmatprep.subr.bf16.mxu0 %v2754_v0 }
 0x120   : > { %2428 = vmatprep.subr.bf16.mxu1 %v2754_v0 }
 0x122   : > { %2400 = vmatpush3.bf16.msra.mxu0 %v2588_v46 }
 0x123   : > { %2436 = vmatpush3.bf16.msra.mxu1 %v2588_v46 }
 0x124   : > { %2346 = vmatmul.mubr.bf16.gmra.mrb[76].mxu0 %v1188_v47 }
 0x125   : > { %2382 = vmatmul.mubr.bf16.gmra.mrb[76].mxu1 %v1351_v48  ;;  %2401 = vmatprep.mubr.msk.bf16.mxu0 %vm2755_vm0, %v2754_v0 }
 0x126   : > { %2413 = vmatprep.mubr.msk.bf16.mxu1 %vm2755_vm0, %v2754_v0 }
 0x12c   : > { %2402 = vmatmul.mubr.bf16.vlgmr.msra.gmra.mrb[80].mxu0 %v1510_v53 }
 0x12d   : > { %2414 = vmatmul.mubr.bf16.vlgmr.msra.gmra.mrb[80].mxu1 %v1513_v54  ;;  %2405 = vmatprep.mubr.msk.bf16.mxu0 %vm2755_vm0, %v2754_v0 }
 0x12e   : > { %2417 = vmatprep.mubr.msk.bf16.mxu1 %vm2755_vm0, %v2754_v0 }
 0x134   : > { %2406 = vmatmul.mubr.bf16.gmra.mrb[84].mxu0 %v1511_v59 }
 0x135   : > { %2418 = vmatmul.mubr.bf16.gmra.mrb[84].mxu1 %v1514_v60  ;;  %2409 = vmatprep.mubr.msk.bf16.mxu0 %vm2755_vm0, %v2754_v0 }
 0x13c   : > { %2410 = vmatmul.mubr.bf16.gmra.mrb[88].mxu0 %v1512_v63 }
 0x15f   : > { %v362_v1 = vpop.f32.mrb[0].mxu0  ;;  %v483_v2 = vpop.f32.mrb[0].mxu1 }
 0x160   : > { %v2115_v3 = vpop.f32.mrb[1].mxu0  ;;  %v484_v4 = vadd.f32 %v483_v2, %v362_v1  ;;  %v2151_v5 = vpop.f32.mrb[1].mxu1 }
 0x161   : > { %v365_v6 = vpop.f32.mrb[2].mxu0  ;;  %v486_v7 = vpop.f32.mrb[2].mxu1 }
 0x162   : > { %v2116_v8 = vpop.f32.mrb[3].mxu0  ;;  %v487_v9 = vadd.f32 %v486_v7, %v365_v6  ;;  %v2152_v10 = vpop.f32.mrb[3].mxu1 }
 0x167   : > { %v370_v11 = vpop.f32.mrb[4].mxu0 }
 0x168   : > { %v491_v12 = vpop.f32.mrb[4].mxu1  ;;  %v2119_v13 = vpop.f32.mrb[5].mxu0 }
 0x169   : > { %v492_v14 = vadd.f32 %v491_v12, %v370_v11  ;;  %v2155_v15 = vpop.f32.mrb[5].mxu1  ;;  %v373_v0 = vpop.f32.mrb[6].mxu0 }
 0x16a   : > { %v494_v16 = vpop.f32.mrb[6].mxu1  ;;  %v2120_v17 = vpop.f32.mrb[7].mxu0 }
 0x16b   : > { %v495_v18 = vadd.f32 %v494_v16, %v373_v0  ;;  %v2156_v19 = vpop.f32.mrb[7].mxu1 }
 0x16f   : > { %v378_v20 = vpop.f32.mrb[8].mxu0 }
 0x170   : > { %v499_v21 = vpop.f32.mrb[8].mxu1  ;;  %v2123_v22 = vpop.f32.mrb[9].mxu0 }
 0x171   : > { %v500_v23 = vadd.f32 %v499_v21, %v378_v20  ;;  %v2159_v24 = vpop.f32.mrb[9].mxu1  ;;  %v381_v25 = vpop.f32.mrb[10].mxu0 }
 0x172   : > { %v502_v26 = vpop.f32.mrb[10].mxu1  ;;  %v2124_v27 = vpop.f32.mrb[11].mxu0 }
 0x173   : > { %v503_v28 = vadd.f32 %v502_v26, %v381_v25  ;;  %v2160_v29 = vpop.f32.mrb[11].mxu1 }
 0x177   : > { %v386_v30 = vpop.f32.mrb[12].mxu0 }
 0x178   : > { %v507_v31 = vpop.f32.mrb[12].mxu1  ;;  %v2127_v32 = vpop.f32.mrb[13].mxu0 }
 0x179   : > { %v508_v33 = vadd.f32 %v507_v31, %v386_v30  ;;  %v2163_v34 = vpop.f32.mrb[13].mxu1  ;;  %v389_v35 = vpop.f32.mrb[14].mxu0 }
 0x17a   : > { %v510_v36 = vpop.f32.mrb[14].mxu1  ;;  %v2128_v37 = vpop.f32.mrb[15].mxu0 }
 0x17b   : > { %v511_v38 = vadd.f32 %v510_v36, %v389_v35  ;;  %v2164_v39 = vpop.f32.mrb[15].mxu1 }
 0x17f   : > { %v394_v40 = vpop.f32.mrb[16].mxu0 }
 0x180   : > { %v515_v41 = vpop.f32.mrb[16].mxu1  ;;  %v2131_v42 = vpop.f32.mrb[17].mxu0 }
 0x181   : > { %v516_v43 = vadd.f32 %v515_v41, %v394_v40  ;;  %v2167_v44 = vpop.f32.mrb[17].mxu1  ;;  %v397_v45 = vpop.f32.mrb[18].mxu0 }
 0x182   : > { %v518_v46 = vpop.f32.mrb[18].mxu1  ;;  %v2132_v47 = vpop.f32.mrb[19].mxu0 }
 0x183   : > { %v519_v48 = vadd.f32 %v518_v46, %v397_v45  ;;  %v2168_v49 = vpop.f32.mrb[19].mxu1 }
 0x187   : > { %v636_v50 = vpop.f32.mrb[20].mxu0 }
 0x188   : > { %v675_v51 = vadd.f32 %v636_v50, %v484_v4  ;;  %v2187_v52 = vpop.f32.mrb[21].mxu0  ;;  %v799_v53 = vpop.f32.mrb[20].mxu1 }
 0x189   : > { %v639_v54 = vpop.f32.mrb[22].mxu0  ;;  %v2223_v55 = vpop.f32.mrb[21].mxu1 }
 0x18a   : > { %v676_v56 = vadd.f32 %v639_v54, %v487_v9  ;;  %v838_v57 = vadd.f32 %v799_v53, %v675_v51  ;;  %v2188_v58 = vpop.f32.mrb[23].mxu0  ;;  %v802_v59 = vpop.f32.mrb[22].mxu1 }
 0x18b   : > { %v2224_v60 = vpop.f32.mrb[23].mxu1 }
 0x18c   : > { %v839_v61 = vadd.f32 %v802_v59, %v676_v56 }
 0x18f   : > { %v644_v62 = vpop.f32.mrb[24].mxu0 }
 0x190   : > { %v677_v63 = vadd.f32 %v644_v62, %v492_v14  ;;  %v2191_v1 = vpop.f32.mrb[25].mxu0  ;;  %v807_v2 = vpop.f32.mrb[24].mxu1 }
 0x191   : > { %v647_v3 = vpop.f32.mrb[26].mxu0  ;;  %v2227_v5 = vpop.f32.mrb[25].mxu1 }
 0x192   : > { %v678_v6 = vadd.f32 %v647_v3, %v495_v18  ;;  %v840_v7 = vadd.f32 %v807_v2, %v677_v63  ;;  %v2192_v8 = vpop.f32.mrb[27].mxu0  ;;  %v810_v4 = vpop.f32.mrb[26].mxu1 }
 0x193   : > { %v2228_v10 = vpop.f32.mrb[27].mxu1 }
 0x194   : > { %v841_v11 = vadd.f32 %v810_v4, %v678_v6 }
 0x197   : > { %v652_v12 = vpop.f32.mrb[28].mxu0 }
 0x198   : > { %v679_v13 = vadd.f32 %v652_v12, %v500_v23  ;;  %v2195_v9 = vpop.f32.mrb[29].mxu0  ;;  %v815_v15 = vpop.f32.mrb[28].mxu1 }
 0x199   : > { %v655_v0 = vpop.f32.mrb[30].mxu0  ;;  %v2231_v16 = vpop.f32.mrb[29].mxu1 }
 0x19a   : > { %v680_v17 = vadd.f32 %v655_v0, %v503_v28  ;;  %v842_v19 = vadd.f32 %v815_v15, %v679_v13  ;;  %v2196_v20 = vpop.f32.mrb[31].mxu0  ;;  %v818_v14 = vpop.f32.mrb[30].mxu1 }
 0x19b   : > { %v2232_v21 = vpop.f32.mrb[31].mxu1 }
 0x19c   : > { %v843_v22 = vadd.f32 %v818_v14, %v680_v17 }
 0x19f   : > { %v660_v24 = vpop.f32.mrb[32].mxu0 }
 0x1a0   : > { %v681_v25 = vadd.f32 %v660_v24, %v508_v33  ;;  %v2199_v18 = vpop.f32.mrb[33].mxu0  ;;  %v823_v26 = vpop.f32.mrb[32].mxu1 }
 0x1a1   : > { %v663_v27 = vpop.f32.mrb[34].mxu0  ;;  %v2235_v29 = vpop.f32.mrb[33].mxu1 }
 0x1a2   : > { %v682_v30 = vadd.f32 %v663_v27, %v511_v38  ;;  %v844_v31 = vadd.f32 %v823_v26, %v681_v25  ;;  %v2200_v32 = vpop.f32.mrb[35].mxu0  ;;  %v826_v23 = vpop.f32.mrb[34].mxu1 }
 0x1a3   : > { %v2236_v34 = vpop.f32.mrb[35].mxu1 }
 0x1a4   : > { %v845_v35 = vadd.f32 %v826_v23, %v682_v30 }
 0x1a7   : > { %v668_v36 = vpop.f32.mrb[36].mxu0 }
 0x1a8   : > { %v683_v37 = vadd.f32 %v668_v36, %v516_v43  ;;  %v2203_v28 = vpop.f32.mrb[37].mxu0  ;;  %v831_v39 = vpop.f32.mrb[36].mxu1 }
 0x1a9   : > { %v671_v40 = vpop.f32.mrb[38].mxu0  ;;  %v2239_v41 = vpop.f32.mrb[37].mxu1 }
 0x1aa   : > { %v684_v42 = vadd.f32 %v671_v40, %v519_v48  ;;  %v846_v44 = vadd.f32 %v831_v39, %v683_v37  ;;  %v2204_v45 = vpop.f32.mrb[39].mxu0  ;;  %v834_v33 = vpop.f32.mrb[38].mxu1 }
 0x1ab   : > { %v2240_v46 = vpop.f32.mrb[39].mxu1 }
 0x1ac   : > { %v847_v47 = vadd.f32 %v834_v33, %v684_v42 }
 0x1af   : > { %v962_v49 = vpop.f32.mrb[40].mxu0 }
 0x1b0   : > { %v1001_v50 = vadd.f32 %v962_v49, %v838_v57  ;;  %v2259_v38 = vpop.f32.mrb[41].mxu0  ;;  %v1125_v51 = vpop.f32.mrb[40].mxu1 }
 0x1b1   : > { %v965_v52 = vpop.f32.mrb[42].mxu0  ;;  %v2295_v53 = vpop.f32.mrb[41].mxu1 }
 0x1b2   : > { %v1002_v54 = vadd.f32 %v965_v52, %v839_v61  ;;  %v1164_v55 = vadd.f32 %v1125_v51, %v1001_v50  ;;  %v2260_v56 = vpop.f32.mrb[43].mxu0  ;;  %v1128_v43 = vpop.f32.mrb[42].mxu1 }
 0x1b3   : > { %v2296_v58 = vpop.f32.mrb[43].mxu1 }
 0x1b4   : > { %v1165_v59 = vadd.f32 %v1128_v43, %v1002_v54 }
 0x1b7   : > { %v970_v60 = vpop.f32.mrb[44].mxu0 }
 0x1b8   : > { %v1003_v62 = vadd.f32 %v970_v60, %v840_v7  ;;  %v2263_v48 = vpop.f32.mrb[45].mxu0  ;;  %v1133_v63 = vpop.f32.mrb[44].mxu1 }
 0x1b9   : > { %v973_v1 = vpop.f32.mrb[46].mxu0  ;;  %v2299_v2 = vpop.f32.mrb[45].mxu1 }
 0x1ba   : > { %v1004_v3 = vadd.f32 %v973_v1, %v841_v11  ;;  %v1166_v5 = vadd.f32 %v1133_v63, %v1003_v62  ;;  %v2264_v6 = vpop.f32.mrb[47].mxu0  ;;  %v1136_v57 = vpop.f32.mrb[46].mxu1 }
 0x1bb   : > { %v2300_v8 = vpop.f32.mrb[47].mxu1 }
 0x1bc   : > { %v1167_v4 = vadd.f32 %v1136_v57, %v1004_v3 }
 0x1bf   : > { %v978_v10 = vpop.f32.mrb[48].mxu0 }
 0x1c0   : > { %v1005_v12 = vadd.f32 %v978_v10, %v842_v19  ;;  %v2267_v61 = vpop.f32.mrb[49].mxu0  ;;  %v1141_v13 = vpop.f32.mrb[48].mxu1 }
 0x1c1   : > { %v981_v9 = vpop.f32.mrb[50].mxu0  ;;  %v2303_v15 = vpop.f32.mrb[49].mxu1 }
 0x1c2   : > { %v1006_v0 = vadd.f32 %v981_v9, %v843_v22  ;;  %v1168_v16 = vadd.f32 %v1141_v13, %v1005_v12  ;;  %v2268_v17 = vpop.f32.mrb[51].mxu0  ;;  %v1144_v7 = vpop.f32.mrb[50].mxu1 }
 0x1c3   : > { %v2304_v20 = vpop.f32.mrb[51].mxu1 }
 0x1c4   : > { %v1169_v14 = vadd.f32 %v1144_v7, %v1006_v0 }
 0x1c7   : > { %v986_v21 = vpop.f32.mrb[52].mxu0 }
 0x1c8   : > { %v1007_v24 = vadd.f32 %v986_v21, %v844_v31  ;;  %v2271_v11 = vpop.f32.mrb[53].mxu0  ;;  %v1149_v25 = vpop.f32.mrb[52].mxu1 }
 0x1c9   : > { %v989_v18 = vpop.f32.mrb[54].mxu0  ;;  %v2307_v26 = vpop.f32.mrb[53].mxu1 }
 0x1ca   : > { %v1008_v27 = vadd.f32 %v989_v18, %v845_v35  ;;  %v1170_v29 = vadd.f32 %v1149_v25, %v1007_v24  ;;  %v2272_v30 = vpop.f32.mrb[55].mxu0  ;;  %v1152_v19 = vpop.f32.mrb[54].mxu1 }
 0x1cb   : > { %v2308_v32 = vpop.f32.mrb[55].mxu1 }
 0x1cc   : > { %v1171_v23 = vadd.f32 %v1152_v19, %v1008_v27 }
 0x1cf   : > { %v994_v34 = vpop.f32.mrb[56].mxu0 }
 0x1d0   : > { %v1009_v36 = vadd.f32 %v994_v34, %v846_v44  ;;  %v2275_v22 = vpop.f32.mrb[57].mxu0  ;;  %v1157_v37 = vpop.f32.mrb[56].mxu1 }
 0x1d1   : > { %v997_v28 = vpop.f32.mrb[58].mxu0  ;;  %v2311_v39 = vpop.f32.mrb[57].mxu1 }
 0x1d2   : > { %v1010_v40 = vadd.f32 %v997_v28, %v847_v47  ;;  %v1172_v41 = vadd.f32 %v1157_v37, %v1009_v36  ;;  %v2276_v42 = vpop.f32.mrb[59].mxu0  ;;  %v1160_v31 = vpop.f32.mrb[58].mxu1 }
 0x1d3   : > { %v2312_v45 = vpop.f32.mrb[59].mxu1 }
 0x1d4   : > { %v1173_v33 = vadd.f32 %v1160_v31, %v1010_v40 }
 0x1d7   : > { %v1288_v46 = vpop.f32.mrb[60].mxu0 }
 0x1d8   : > { %v1327_v49 = vadd.f32 %v1288_v46, %v1164_v55  ;;  %v2331_v35 = vpop.f32.mrb[61].mxu0  ;;  %v1451_v50 = vpop.f32.mrb[60].mxu1 }
 0x1d9   : > { %v1291_v38 = vpop.f32.mrb[62].mxu0  ;;  %v2367_v51 = vpop.f32.mrb[61].mxu1 }
 0x1da   : > { %v1328_v52 = vadd.f32 %v1291_v38, %v1165_v59  ;;  %v1490_v53 = vadd.f32 %v1451_v50, %v1327_v49  ;;  %v2332_v54 = vpop.f32.mrb[63].mxu0  ;;  %v1454_v44 = vpop.f32.mrb[62].mxu1 }
 0x1db   : > { %v2368_v56 = vpop.f32.mrb[63].mxu1 }
 0x1dc   : > { %v1491_v43 = vadd.f32 %v1454_v44, %v1328_v52 }
 0x1df   : > { %v1296_v58 = vpop.f32.mrb[64].mxu0 }
 0x1e0   : > { %v1329_v60 = vadd.f32 %v1296_v58, %v1166_v5  ;;  %v2335_v47 = vpop.f32.mrb[65].mxu0  ;;  %v1459_v62 = vpop.f32.mrb[64].mxu1 }
 0x1e1   : > { %v1299_v48 = vpop.f32.mrb[66].mxu0  ;;  %v2371_v63 = vpop.f32.mrb[65].mxu1 }
 0x1e2   : > { %v1330_v1 = vadd.f32 %v1299_v48, %v1167_v4  ;;  %v3244_v2 = vadd.f32 %v1459_v62, %v1329_v60  ;;  %v2336_v55 = vpop.f32.mrb[67].mxu0  ;;  %v1462_v3 = vpop.f32.mrb[66].mxu1 }
 0x1e3   : > { %v2372_v6 = vpop.f32.mrb[67].mxu1 }
 0x1e4   : > { %v3246_v57 = vadd.f32 %v1462_v3, %v1330_v1 }
 0x1e7   : > { %v1304_v59 = vpop.f32.mrb[68].mxu0 }
 0x1e8   : > { %v1331_v8 = vadd.f32 %v1304_v59, %v1168_v16  ;;  %v2339_v10 = vpop.f32.mrb[69].mxu0  ;;  %v1467_v12 = vpop.f32.mrb[68].mxu1 }
 0x1e9   : > { %v1307_v61 = vpop.f32.mrb[70].mxu0  ;;  %v2375_v13 = vpop.f32.mrb[69].mxu1 }
 0x1ea   : > { %v1332_v9 = vadd.f32 %v1307_v61, %v1169_v14  ;;  %v3248_v5 = vadd.f32 %v1467_v12, %v1331_v8  ;;  %v2340_v15 = vpop.f32.mrb[71].mxu0  ;;  %v1470_v0 = vpop.f32.mrb[70].mxu1 }
 0x1eb   : > { %v2376_v17 = vpop.f32.mrb[71].mxu1 }
 0x1ec   : > { %v3250_v4 = vadd.f32 %v1470_v0, %v1332_v9 }
 0x1ef   : > { %v1312_v7 = vpop.f32.mrb[72].mxu0 }
 0x1f0   : > { %v1333_v20 = vadd.f32 %v1312_v7, %v1170_v29  ;;  %v2343_v21 = vpop.f32.mrb[73].mxu0  ;;  %v1475_v24 = vpop.f32.mrb[72].mxu1 }
 0x1f1   : > { %v1315_v11 = vpop.f32.mrb[74].mxu0  ;;  %v2379_v25 = vpop.f32.mrb[73].mxu1 }
 0x1f2   : > { %v1334_v18 = vadd.f32 %v1315_v11, %v1171_v23  ;;  %v1496_v16 = vadd.f32 %v1475_v24, %v1333_v20  ;;  %v2344_v26 = vpop.f32.mrb[75].mxu0  ;;  %v1478_v27 = vpop.f32.mrb[74].mxu1  ;;  %v1927_v23 = vld [vmem:[#allocation7] ss:$0 sm:$0xff] }
 0x1f3   : > { %v2380_v30 = vpop.f32.mrb[75].mxu1 }
 0x1f4   : > { %v1497_v19 = vadd.f32 %v1478_v27, %v1334_v18 }
 0x1f7   : > { %v1320_v14 = vpop.f32.mrb[76].mxu0 }
 0x1f8   : > { %v1335_v32 = vadd.f32 %v1320_v14, %v1172_v41  ;;  %v2347_v34 = vpop.f32.mrb[77].mxu0  ;;  %v1483_v36 = vpop.f32.mrb[76].mxu1 }
 0x1f9   : > { %v1323_v22 = vpop.f32.mrb[78].mxu0  ;;  %v2383_v37 = vpop.f32.mrb[77].mxu1 }
 0x1fa   : > { %v1336_v28 = vadd.f32 %v1323_v22, %v1173_v33  ;;  %v1498_v39 = vadd.f32 %v1483_v36, %v1335_v32  ;;  %v2348_v40 = vpop.f32.mrb[79].mxu0  ;;  %v1486_v29 = vpop.f32.mrb[78].mxu1 }
 0x1fb   : > { %v2384_v42 = vpop.f32.mrb[79].mxu1 }
 0x1fc   : > { %v1499_v31 = vadd.f32 %v1486_v29, %v1336_v28 }
 0x1ff   : > { %v1614_v45 = vpop.f32.mrb[80].mxu0 }
 0x200   : > { %v1653_v46 = vadd.f32 %v1614_v45, %v1490_v53  ;;  %v1638_v49 = vpop.f32.mrb[80].mxu1  ;;  %v2403_v35 = vpop.f32.mrb[81].mxu0 }
 0x201   : > { %v1659_v50 = vadd.f32 %v1638_v49, %v1496_v16  ;;  %v2415_v38 = vpop.f32.mrb[81].mxu1  ;;  %v1617_v51 = vpop.f32.mrb[82].mxu0 }
 0x202   : > { %v1670_v41 = vadd.f32 %v1927_v23, %v1653_v46  ;;  %v1654_v52 = vadd.f32 %v1617_v51, %v1491_v43  ;;  %v1641_v54 = vpop.f32.mrb[82].mxu1  ;;  %v2404_v44 = vpop.f32.mrb[83].mxu0 }
 0x203   : > { %v1676_v56 = vadd.f32 %v1927_v23, %v1659_v50  ;;  %v1660_v33 = vadd.f32 %v1641_v54, %v1497_v19  ;;  %v2416_v58 = vpop.f32.mrb[83].mxu1 }
 0x204   : > { %v1671_v60 = vadd.f32 %v1927_v23, %v1654_v52  ;;  %v1680_v62 = vmax.f32 %v1670_v41, 0.0 }
 0x205   : > { %v1677_v47 = vadd.f32 %v1927_v23, %v1660_v33  ;;  %v1686_v63 = vmax.f32 %v1676_v56, 0.0 }
 0x206   : > { %v1681_v48 = vmax.f32 %v1671_v60, 0.0 }
 0x207   : > { %v1687_v1 = vmax.f32 %v1677_v47, 0.0  ;;  %v1622_v53 = vpop.f32.mrb[84].mxu0 }
 0x208   : > { %v1954_v55 = vpack.c.bf16 %v1681_v48, %v1680_v62  ;;  %v1655_v3 = vadd.f32 %v1622_v53, %v3244_v2  ;;  %v1646_v6 = vpop.f32.mrb[84].mxu1  ;;  %v2407_v59 = vpop.f32.mrb[85].mxu0 }
 0x209   : > { %v1969_v8 = vpack.c.bf16 %v1687_v1, %v1686_v63  ;;  %v1661_v43 = vadd.f32 %v1646_v6, %v1498_v39  ;;  %v2419_v10 = vpop.f32.mrb[85].mxu1  ;;  %v1625_v12 = vpop.f32.mrb[86].mxu0 }
 0x20a   : > { %1955 = vst [vmem:[%s3254_s20] sm:$0xff] %v1954_v55   ;;  %v1672_v61 = vadd.f32 %v1927_v23, %v1655_v3  ;;  %v1656_v13 = vadd.f32 %v1625_v12, %v3246_v57  ;;  %v1649_v9 = vpop.f32.mrb[86].mxu1  ;;  %v2408_v15 = vpop.f32.mrb[87].mxu0 }
 0x20b   : > { %1978 = vst [vmem:[%s3254_s20 + $0x18] sm:$0xff] %v1969_v8   ;;  %v1678_v0 = vadd.f32 %v1927_v23, %v1661_v43  ;;  %v1662_v2 = vadd.f32 %v1649_v9, %v1499_v31  ;;  %v2420_v17 = vpop.f32.mrb[87].mxu1 }
 0x20c   : > { %v1673_v7 = vadd.f32 %v1927_v23, %v1656_v13  ;;  %v1682_v21 = vmax.f32 %v1672_v61, 0.0 }
 0x20d   : > { %v1679_v20 = vadd.f32 %v1927_v23, %v1662_v2  ;;  %v1688_v11 = vmax.f32 %v1678_v0, 0.0 }
 0x20e   : > { %v1683_v24 = vmax.f32 %v1673_v7, 0.0 }
 0x20f   : > { %v1689_v25 = vmax.f32 %v1679_v20, 0.0  ;;  %v1630_v18 = vpop.f32.mrb[88].mxu0 }
 0x210   : > { %v1959_v16 = vpack.c.bf16 %v1683_v24, %v1682_v21  ;;  %v1657_v57 = vadd.f32 %v1630_v18, %v3248_v5  ;;  %v2411_v26 = vpop.f32.mrb[89].mxu0 }
 0x211   : > { %v1974_v27 = vpack.c.bf16 %v1689_v25, %v1688_v11  ;;  %v1633_v30 = vpop.f32.mrb[90].mxu0 }
 0x212   : > { %1976 = vst [vmem:[%s3254_s20 + $0x8] sm:$0xff] %v1959_v16   ;;  %v1674_v19 = vadd.f32 %v1927_v23, %v1657_v57  ;;  %v1658_v14 = vadd.f32 %v1633_v30, %v3250_v4  ;;  %v2412_v32 = vpop.f32.mrb[91].mxu0 }
 0x213   : > { %1979 = vst [vmem:[%s3254_s20 + $0x20] sm:$0xff] %v1974_v27  }
 0x214   : > { %v1675_v34 = vadd.f32 %v1927_v23, %v1658_v14  ;;  %v1684_v5 = vmax.f32 %v1674_v19, 0.0 }
 0x216   : > { %v1685_v36 = vmax.f32 %v1675_v34, 0.0 }
 0x218   : > { %v1964_v22 = vpack.c.bf16 %v1685_v36, %v1684_v5 }
 0x21a   : > { %1977 = vst [vmem:[%s3254_s20 + $0x10] sm:$0xff] %v1964_v22  }
 0x21b   : > { %2688 = shalt.err (!%p2685_p2)
}
 0x21c   : > { %s2689_s17 = scalar_lea.hbm %s3270_s23, 640  ;;  %s2693_s29 = scalar_lea.hbm %s3318_s3, 1280 }
 0x21d   : > { %p2690_p13 = scmp.ne.s32.totalorder %s3270_s23, %s2689_s17  ;;  %p2694_p4 = scmp.lt.u32.totalorder %s3270_s23, %s3318_s3 }
 0x21e   : > { %p2695_p5 = scmp.lt.u32.totalorder %s2693_s29, %s2689_s17  ;;  %p2697_p11 = scmp.lt.u32.totalorder %s2689_s17, %s3270_s23 }
 0x21f   : > { %p2691_p6 = pnand %p2690_p13, %p3332_p0 }
 0x220   : > { %p2696_p8 = por %p2695_p5, %p2694_p4 }
 0x221   : > { %p2692_p10 = pneg %p2691_p6 }
 0x222   : > { %p2698_p1 = por %p2697_p11, %p2696_p8 }
 0x224   : > { %p2699_p3 = pnand %p2698_p1, %p2692_p10 }
 0x226   : > { %2702 = shalt.err (!%p2699_p3)
}
 0x227   : > { %s2757_s18 = smov 64   ;;  %s2758_s20 = smov 4  }
 0x228   : > { %2452 = dma.vmem_to_hbm [thread:$0]  (%p3332_p0), %s3265_s11, 640, %s3270_s23, %s1741_s6, %s2757_s18, %s2757_s18, %s2758_s20  }
 0x229 PF: > { %s1769_s24 = sand.u32 1, %s2733_s12   ;;  %p3333_p7 = scmp.ne.s32.totalorder %s3323_s19, 0 }
 0x22a   : > { %p3334_p9 = scmp.ge.s32.totalorder %s2745_s15, 2  ;;  %s1770_s27 = scalar_lea.sflag [#allocation4], %s1769_s24 }
 0x22c   : > { %p2466_p12 = pnand %p3334_p9, %p3333_p7 }
 0x22e   : > { %2728 = dma.done.wait (!%p2466_p12), %s1770_s27, 640  }
 0x22f   : > { %2730 = vsyncadd (!%p2466_p12), %s1770_s27, 4294966656  ;;  %p17_p2 = scmp.ge.s32.totalorder %s2890_s5, 4   ;;  %s3335_s12 = smov %s2737_s13 }
 0x230   : > { %s3336_s13 = smov %s2741_s14  ;;  %s3337_s14 = smov %s2906_s8 }
 0x231   : > { %s3338_s15 = smov %s2890_s5  ;;  %19 = sbr.rel (!%p17_p2) target bundleno = 6 (0x6), region = 93 }
 0x238   :  { %1775 = vsyncpa [#allocation3], 1 }
 0x239   :  { %1777 = vsyncpa [#allocation3 + $0x1], 1 }
 0x23a   :  { %1778 = vsyncpa [#allocation6], 1 }
 0x23b   :  { %1779 = vsyncpa [#allocation4], 1 }
 0x23c   :  { %1781 = vsyncpa [#allocation4 + $0x1], 1 }

</bundles_post_ra>
